<compile_context>
chip_gen: v6e
topology: v6e:2x2x1
jax: 0.10.0
libtpu: 0.0.40
codegen_flags: <defaults>
</compile_context>

<pallas_src>
import functools

import jax
import jax.numpy as jnp
from jax import lax
from jax.experimental import pallas as pl
from jax.experimental.pallas import tpu as pltpu

BN_EPS = 1e-5


def _round_up(x, m):
    return (x + m - 1) // m * m


# ---------------------------------------------------------------------------
# Shared MLP tile body: folded BN -> fc1/relu -> fc2/relu -> fc3/tanh.
# bf16 MXU operands, f32 accumulation, f32 elementwise math, lane-dense output.
# ---------------------------------------------------------------------------
def _mlp_tile(x_tile, scale, shift,
              w1_ref, b1_ref, w2_ref, b2_ref, w3_ref, b3_ref, o_ref):
    # Folded BatchNorm: one f32 FMA per element, then a single cast for the MXU.
    xn = (x_tile * scale + shift).astype(jnp.bfloat16)

    h1 = jnp.dot(xn, w1_ref[...], preferred_element_type=jnp.float32) + b1_ref[...]
    h1 = jnp.maximum(h1, 0.0).astype(jnp.bfloat16)   # bf16 intermediate: halves VMEM traffic

    h2 = jnp.dot(h1, w2_ref[...], preferred_element_type=jnp.float32) + b2_ref[...]
    h2 = jnp.maximum(h2, 0.0).astype(jnp.bfloat16)

    y = jnp.dot(h2, w3_ref[...], preferred_element_type=jnp.float32) + b3_ref[...]
    o_ref[...] = jnp.tanh(y)


# ---------------------------------------------------------------------------
# Fused kernel (small/medium B): full-batch BN stats + folded BN + MLP in one
# launch. x is passed twice: once un-tiled (VMEM-resident, constant index_map)
# for the statistics, once batch-tiled for the MLP. Stats are recomputed per
# tile (few KFLOPs) so the batch axis stays "parallel"-safe on v7x megacore.
# ---------------------------------------------------------------------------
def actor_fused_kernel(xfull_ref, g_ref, be_ref, xt_ref,
                       w1_ref, b1_ref, w2_ref, b2_ref, w3_ref, b3_ref, o_ref):
    xf = xfull_ref[...]
    inv_n = 1.0 / xf.shape[0]
    mean = jnp.sum(xf, axis=0, keepdims=True) * inv_n
    diff = xf - mean
    var = jnp.sum(diff * diff, axis=0, keepdims=True) * inv_n    # biased (PyTorch train fwd)
    scale = g_ref[...] * lax.rsqrt(var + BN_EPS)
    shift = be_ref[...] - mean * scale
    _mlp_tile(xt_ref[...], scale, shift,
              w1_ref, b1_ref, w2_ref, b2_ref, w3_ref, b3_ref, o_ref)


# ---------------------------------------------------------------------------
# Fallback pass 1 (very large B): batch-BLOCKED BN statistics. sum / sumsq are
# accumulated in VMEM scratch across an "arbitrary" grid axis; boundary rows
# past B are masked out so the reduction is exact.
# ---------------------------------------------------------------------------
def bn_stats_kernel(x_ref, g_ref, be_ref, s_ref, t_ref, sum_sc, sq_sc,
                    *, batch, tile):
    i = pl.program_id(0)

    @pl.when(i == 0)
    def _():
        sum_sc[...] = jnp.zeros_like(sum_sc)
        sq_sc[...] = jnp.zeros_like(sq_sc)

    rows = lax.broadcasted_iota(jnp.int32, x_ref.shape, 0) + i * tile
    xv = jnp.where(rows < batch, x_ref[...], 0.0)
    sum_sc[...] += jnp.sum(xv, axis=0, keepdims=True)
    sq_sc[...] += jnp.sum(xv * xv, axis=0, keepdims=True)

    @pl.when(i == pl.num_programs(0) - 1)
    def _():
        inv_n = 1.0 / batch
        mean = sum_sc[...] * inv_n
        var = sq_sc[...] * inv_n - mean * mean
        scale = g_ref[...] * lax.rsqrt(var + BN_EPS)
        s_ref[...] = scale
        t_ref[...] = be_ref[...] - mean * scale


# ---------------------------------------------------------------------------
# Fallback pass 2: batch-tiled MLP taking precomputed (scale, shift).
# ---------------------------------------------------------------------------
def actor_mlp_kernel(s_ref, t_ref, xt_ref,
                     w1_ref, b1_ref, w2_ref, b2_ref, w3_ref, b3_ref, o_ref):
    _mlp_tile(xt_ref[...], s_ref[...], t_ref[...],
              w1_ref, b1_ref, w2_ref, b2_ref, w3_ref, b3_ref, o_ref)


# ---------------------------------------------------------------------------
# Host-side wrapper.
# ---------------------------------------------------------------------------
def actor_forward(state, params, *, fused_x_bytes_limit=1 << 20):
    x = state.astype(jnp.float32)
    B, state_size = x.shape
    fc1 = params["w1"].shape[1]
    fc2 = params["w2"].shape[1]
    n3_pad = params["w3"].shape[1]            # lane-padded (multiple of 128)
    action_size = params["action_size"]

    # Batch tile: >= 2 grid steps whenever possible (both v7x TensorCores get
    # work), MXU-aligned for larger B, capped at 512 rows (per-step overhead
    # amortized, per-tile VMEM well under limits on all generations).
    if B >= 256:
        tb = min(512, _round_up(pl.cdiv(B, 2), 128))
    else:
        tb = max(8, _round_up(pl.cdiv(B, 2), 8))
    nb = pl.cdiv(B, tb)                        # no jnp.pad: partial boundary block is fine

    resident = lambda i: (0, 0)                # weights / BN params stay VMEM-resident
    w_specs = [
        pl.BlockSpec((state_size, fc1), resident),   # w1 (bf16)
        pl.BlockSpec((1, fc1), resident),            # b1
        pl.BlockSpec((fc1, fc2), resident),          # w2 (bf16)
        pl.BlockSpec((1, fc2), resident),            # b2
        pl.BlockSpec((fc2, n3_pad), resident),       # w3 (bf16, lane-padded)
        pl.BlockSpec((1, n3_pad), resident),         # b3 (lane-padded)
    ]
    xt_spec = pl.BlockSpec((tb, state_size), lambda i: (i, 0))
    out_spec = pl.BlockSpec((tb, n3_pad), lambda i: (i, 0))

    flops = 2 * B * (state_size * fc1 + fc1 * fc2 + fc2 * n3_pad)
    bytes_accessed = (
        B * state_size * 4 + B * n3_pad * 4                        # acts in/out
        + 2 * (state_size * fc1 + fc1 * fc2 + fc2 * n3_pad)        # bf16 weights
        + 4 * (fc1 + fc2 + n3_pad + 2 * state_size))               # biases + BN
    cost = pl.CostEstimate(flops=flops, transcendentals=B * n3_pad,
                           bytes_accessed=bytes_accessed)

    weight_args = (params["w1"], params["b1"], params["w2"], params["b2"],
                   params["w3"], params["b3"])

    if B * state_size * 4 <= fused_x_bytes_limit:
        # ---- single-launch fused path -------------------------------------
        out = pl.pallas_call(
            actor_fused_kernel,
            out_shape=jax.ShapeDtypeStruct((B, n3_pad), jnp.float32),
            grid=(nb,),
            in_specs=[pl.BlockSpec((B, state_size), resident),   # full x (stats)
                      pl.BlockSpec((1, state_size), resident),   # gamma
                      pl.BlockSpec((1, state_size), resident),   # beta
                      xt_spec] + w_specs,                        # tiled x + weights
            out_specs=out_spec,
            compiler_params=pltpu.CompilerParams(
                dimension_semantics=("parallel",)),
            cost_estimate=cost,
        )(x, params["gamma"], params["beta"], x, *weight_args)
    else:
        # ---- pass 1: batch-blocked BN statistics ---------------------------
        ts = max(8, min(1024, _round_up(B, 8)))
        ns = pl.cdiv(B, ts)
        scale, shift = pl.pallas_call(
            functools.partial(bn_stats_kernel, batch=B, tile=ts),
            out_shape=(jax.ShapeDtypeStruct((1, state_size), jnp.float32),
                       jax.ShapeDtypeStruct((1, state_size), jnp.float32)),
            grid=(ns,),
            in_specs=[pl.BlockSpec((ts, state_size), lambda i: (i, 0)),
                      pl.BlockSpec((1, state_size), resident),
                      pl.BlockSpec((1, state_size), resident)],
            out_specs=(pl.BlockSpec((1, state_size), resident),
                       pl.BlockSpec((1, state_size), resident)),
            scratch_shapes=[pltpu.VMEM((1, state_size), jnp.float32),
                            pltpu.VMEM((1, state_size), jnp.float32)],
            compiler_params=pltpu.CompilerParams(
                dimension_semantics=("arbitrary",)),
        )(x, params["gamma"], params["beta"])

        # ---- pass 2: batch-tiled fused MLP ---------------------------------
        out = pl.pallas_call(
            actor_mlp_kernel,
            out_shape=jax.ShapeDtypeStruct((B, n3_pad), jnp.float32),
            grid=(nb,),
            in_specs=[pl.BlockSpec((1, state_size), resident),
                      pl.BlockSpec((1, state_size), resident),
                      xt_spec] + w_specs,
            out_specs=out_spec,
            compiler_params=pltpu.CompilerParams(
                dimension_semantics=("parallel",)),
            cost_estimate=cost,
        )(scale, shift, x, *weight_args)

    return out[:, :action_size]


# ---------------------------------------------------------------------------
# Parameter init mirroring Actor.reset_parameters() (PyTorch quirk preserved:
# hidden_init uses weight.size()[0] == out_features as the fan_in).
# ---------------------------------------------------------------------------
def init_actor_params(key, state_size, action_size, fc1_units=512, fc2_units=256):
    k1, k2, k3, kb1, kb2, kb3 = jax.random.split(key, 6)
    lim1 = 1.0 / jnp.sqrt(jnp.float32(fc1_units))
    lim2 = 1.0 / jnp.sqrt(jnp.float32(fc2_units))

    # weights stored as (in_features, out_features) for x @ W
    w1 = jax.random.uniform(k1, (state_size, fc1_units), jnp.float32, -lim1, lim1)
    w2 = jax.random.uniform(k2, (fc1_units, fc2_units), jnp.float32, -lim2, lim2)
    w3 = jax.random.uniform(k3, (fc2_units, action_size), jnp.float32, -0.003, 0.003)

    # biases: PyTorch Linear default uniform(-1/sqrt(in_features), +...)
    bl1 = 1.0 / jnp.sqrt(jnp.float32(state_size))
    bl2 = 1.0 / jnp.sqrt(jnp.float32(fc1_units))
    bl3 = 1.0 / jnp.sqrt(jnp.float32(fc2_units))
    b1 = jax.random.uniform(kb1, (1, fc1_units), jnp.float32, -bl1, bl1)
    b2 = jax.random.uniform(kb2, (1, fc2_units), jnp.float32, -bl2, bl2)
    b3 = jax.random.uniform(kb3, (1, action_size), jnp.float32, -bl3, bl3)

    # BatchNorm1d affine (defaults gamma=1, beta=0), 2D for lane broadcasting
    gamma = jnp.ones((1, state_size), jnp.float32)
    beta = jnp.zeros((1, state_size), jnp.float32)

    # Lane-pad the final layer to a multiple of 128 for unmasked stores.
    n3_pad = _round_up(max(action_size, 128), 128)
    w3_pad = jnp.zeros((fc2_units, n3_pad), jnp.float32).at[:, :action_size].set(w3)
    b3_pad = jnp.zeros((1, n3_pad), jnp.float32).at[:, :action_size].set(b3)

    return dict(
        # kernel operands: bf16 weights for the MXU, f32 biases / BN affine
        w1=w1.astype(jnp.bfloat16), b1=b1,
        w2=w2.astype(jnp.bfloat16), b2=b2,
        w3=w3_pad.astype(jnp.bfloat16), b3=b3_pad,
        gamma=gamma, beta=beta,
        action_size=action_size,
        # f32 originals kept for the pure-JAX reference
        w1_f32=w1, w2_f32=w2, w3_f32=w3,
    )


def actor_ref(state, p):
    """Pure-JAX f32 reference (matches the PyTorch training-mode forward)."""
    x = state.astype(jnp.float32)
    mean = jnp.mean(x, axis=0, keepdims=True)
    var = jnp.mean((x - mean) ** 2, axis=0, keepdims=True)
    x = (x - mean) / jnp.sqrt(var + BN_EPS) * p["gamma"] + p["beta"]
    x = jnp.maximum(x @ p["w1_f32"] + p["b1"], 0.0)
    x = jnp.maximum(x @ p["w2_f32"] + p["b2"], 0.0)
    a = p["action_size"]
    return jnp.tanh(x @ p["w3_f32"] + p["b3"][:, :a])


if __name__ == "__main__":
    key = jax.random.PRNGKey(0)
    k_param, k_state = jax.random.split(key)

    state_size = 32
    action_size = 8
    params = init_actor_params(k_param, state_size, action_size)

    # (batch, force two-pass fallback?): MXU-aligned batch, ragged batch, and
    # the large-batch fallback path exercised explicitly.
    cases = ((256, False), (50, False), (256, True))
    for batch, force_two_pass in cases:
        k_state, sub = jax.random.split(k_state)
        state = jax.random.normal(sub, (batch, state_size), jnp.float32)

        limit = 0 if force_two_pass else (1 << 20)
        out = jax.block_until_ready(
            actor_forward(state, params, fused_x_bytes_limit=limit))
        ref = actor_ref(state, params)

        assert out.shape == (batch, action_size), out.shape
        err = float(jnp.max(jnp.abs(out - ref)))
        assert jnp.allclose(out, ref, atol=2e-2, rtol=2e-2), (
            f"mismatch vs JAX reference (batch={batch}, two_pass={force_two_pass}), "
            f"max abs err {err}")

    print("KERNEL_OK")
</pallas_src>

<mosaic_0001>
module attributes {stable_mosaic.version = 11 : i64} {
  func.func @actor_fused_kernel(%arg0: i32, %arg1: memref<256x32xf32, #tpu.memory_space<vmem>>, %arg2: memref<1x32xf32, #tpu.memory_space<vmem>>, %arg3: memref<1x32xf32, #tpu.memory_space<vmem>>, %arg4: memref<128x32xf32, #tpu.memory_space<vmem>>, %arg5: memref<32x512xbf16, #tpu.memory_space<vmem>>, %arg6: memref<1x512xf32, #tpu.memory_space<vmem>>, %arg7: memref<512x256xbf16, #tpu.memory_space<vmem>>, %arg8: memref<1x256xf32, #tpu.memory_space<vmem>>, %arg9: memref<256x128xbf16, #tpu.memory_space<vmem>>, %arg10: memref<1x128xf32, #tpu.memory_space<vmem>>, %arg11: memref<128x128xf32, #tpu.memory_space<vmem>>) attributes {dimension_semantics = [#tpu.dimension_semantics<parallel>], iteration_bounds = array<i64: 2>, scalar_prefetch = 0 : i64, scratch_operands = 0 : i64, tpu.core_type = #tpu.core_type<tc>, window_params = [{pipeline_mode = #tpu.pipeline_mode<synchronous>, transform_indices = @transform_0, window_bounds = array<i64: 256, 32>}, {pipeline_mode = #tpu.pipeline_mode<synchronous>, transform_indices = @transform_1, window_bounds = array<i64: 1, 32>}, {pipeline_mode = #tpu.pipeline_mode<synchronous>, transform_indices = @transform_2, window_bounds = array<i64: 1, 32>}, {transform_indices = @transform_3, window_bounds = array<i64: 128, 32>}, {pipeline_mode = #tpu.pipeline_mode<synchronous>, transform_indices = @transform_4, window_bounds = array<i64: 32, 512>}, {pipeline_mode = #tpu.pipeline_mode<synchronous>, transform_indices = @transform_5, window_bounds = array<i64: 1, 512>}, {pipeline_mode = #tpu.pipeline_mode<synchronous>, transform_indices = @transform_6, window_bounds = array<i64: 512, 256>}, {pipeline_mode = #tpu.pipeline_mode<synchronous>, transform_indices = @transform_7, window_bounds = array<i64: 1, 256>}, {pipeline_mode = #tpu.pipeline_mode<synchronous>, transform_indices = @transform_8, window_bounds = array<i64: 256, 128>}, {pipeline_mode = #tpu.pipeline_mode<synchronous>, transform_indices = @transform_9, window_bounds = array<i64: 1, 128>}, {transform_indices = @transform_10, window_bounds = array<i64: 128, 128>}]} {
    %c0 = arith.constant 0 : index
    %c0_0 = arith.constant 0 : index
    %0 = vector.load %arg1[%c0, %c0_0] : memref<256x32xf32, #tpu.memory_space<vmem>>, vector<256x32xf32>
    %cst = arith.constant dense<0.000000e+00> : vector<32xf32>
    %1 = vector.multi_reduction <add>, %0, %cst [0] : vector<256x32xf32> to vector<32xf32>
    %2 = vector.shape_cast %1 : vector<32xf32> to vector<1x32xf32>
    %cst_1 = arith.constant 3.906250e-03 : f32
    %3 = vector.broadcast %cst_1 : f32 to vector<1x32xf32>
    %4 = arith.mulf %2, %3 : vector<1x32xf32>
    %5 = vector.broadcast %4 : vector<1x32xf32> to vector<256x32xf32>
    %6 = arith.subf %0, %5 : vector<256x32xf32>
    %7 = arith.mulf %6, %6 : vector<256x32xf32>
    %cst_2 = arith.constant dense<0.000000e+00> : vector<32xf32>
    %8 = vector.multi_reduction <add>, %7, %cst_2 [0] : vector<256x32xf32> to vector<32xf32>
    %9 = vector.shape_cast %8 : vector<32xf32> to vector<1x32xf32>
    %cst_3 = arith.constant 3.906250e-03 : f32
    %10 = vector.broadcast %cst_3 : f32 to vector<1x32xf32>
    %11 = arith.mulf %9, %10 : vector<1x32xf32>
    %c0_4 = arith.constant 0 : index
    %c0_5 = arith.constant 0 : index
    %12 = vector.load %arg2[%c0_4, %c0_5] : memref<1x32xf32, #tpu.memory_space<vmem>>, vector<1x32xf32>
    %cst_6 = arith.constant 9.99999974E-6 : f32
    %13 = vector.broadcast %cst_6 : f32 to vector<1x32xf32>
    %14 = arith.addf %11, %13 : vector<1x32xf32>
    %15 = math.rsqrt %14 : vector<1x32xf32>
    %16 = arith.mulf %12, %15 : vector<1x32xf32>
    %c0_7 = arith.constant 0 : index
    %c0_8 = arith.constant 0 : index
    %17 = vector.load %arg3[%c0_7, %c0_8] : memref<1x32xf32, #tpu.memory_space<vmem>>, vector<1x32xf32>
    %18 = arith.mulf %4, %16 : vector<1x32xf32>
    %19 = arith.subf %17, %18 : vector<1x32xf32>
    %c0_9 = arith.constant 0 : index
    %c0_10 = arith.constant 0 : index
    %20 = vector.load %arg4[%c0_9, %c0_10] : memref<128x32xf32, #tpu.memory_space<vmem>>, vector<128x32xf32>
    %21 = vector.broadcast %16 : vector<1x32xf32> to vector<128x32xf32>
    %22 = arith.mulf %20, %21 : vector<128x32xf32>
    %23 = vector.broadcast %19 : vector<1x32xf32> to vector<128x32xf32>
    %24 = arith.addf %22, %23 : vector<128x32xf32>
    %25 = arith.truncf %24 : vector<128x32xf32> to vector<128x32xbf16>
    %c0_11 = arith.constant 0 : index
    %c0_12 = arith.constant 0 : index
    %26 = vector.load %arg5[%c0_11, %c0_12] : memref<32x512xbf16, #tpu.memory_space<vmem>>, vector<32x512xbf16>
    %cst_13 = arith.constant dense<0.000000e+00> : vector<128x512xf32>
    %27 = tpu.matmul %25, %26, %cst_13 {dimension_numbers = #tpu.dot_dimension_numbers<[1], [0], [0], [1], [0, 0, 1, 1], [], []>} : vector<128x32xbf16>, vector<32x512xbf16>, vector<128x512xf32> -> vector<128x512xf32>
    %c0_14 = arith.constant 0 : index
    %c0_15 = arith.constant 0 : index
    %28 = vector.load %arg6[%c0_14, %c0_15] : memref<1x512xf32, #tpu.memory_space<vmem>>, vector<1x512xf32>
    %29 = vector.broadcast %28 : vector<1x512xf32> to vector<128x512xf32>
    %30 = arith.addf %27, %29 : vector<128x512xf32>
    %cst_16 = arith.constant 0.000000e+00 : f32
    %31 = vector.broadcast %cst_16 : f32 to vector<128x512xf32>
    %32 = arith.maximumf %30, %31 : vector<128x512xf32>
    %33 = arith.truncf %32 : vector<128x512xf32> to vector<128x512xbf16>
    %c0_17 = arith.constant 0 : index
    %c0_18 = arith.constant 0 : index
    %34 = vector.load %arg7[%c0_17, %c0_18] : memref<512x256xbf16, #tpu.memory_space<vmem>>, vector<512x256xbf16>
    %cst_19 = arith.constant dense<0.000000e+00> : vector<128x256xf32>
    %35 = tpu.matmul %33, %34, %cst_19 {dimension_numbers = #tpu.dot_dimension_numbers<[1], [0], [0], [1], [0, 0, 1, 1], [], []>} : vector<128x512xbf16>, vector<512x256xbf16>, vector<128x256xf32> -> vector<128x256xf32>
    %c0_20 = arith.constant 0 : index
    %c0_21 = arith.constant 0 : index
    %36 = vector.load %arg8[%c0_20, %c0_21] : memref<1x256xf32, #tpu.memory_space<vmem>>, vector<1x256xf32>
    %37 = vector.broadcast %36 : vector<1x256xf32> to vector<128x256xf32>
    %38 = arith.addf %35, %37 : vector<128x256xf32>
    %cst_22 = arith.constant 0.000000e+00 : f32
    %39 = vector.broadcast %cst_22 : f32 to vector<128x256xf32>
    %40 = arith.maximumf %38, %39 : vector<128x256xf32>
    %41 = arith.truncf %40 : vector<128x256xf32> to vector<128x256xbf16>
    %c0_23 = arith.constant 0 : index
    %c0_24 = arith.constant 0 : index
    %42 = vector.load %arg9[%c0_23, %c0_24] : memref<256x128xbf16, #tpu.memory_space<vmem>>, vector<256x128xbf16>
    %cst_25 = arith.constant dense<0.000000e+00> : vector<128x128xf32>
    %43 = tpu.matmul %41, %42, %cst_25 {dimension_numbers = #tpu.dot_dimension_numbers<[1], [0], [0], [1], [0, 0, 1, 1], [], []>} : vector<128x256xbf16>, vector<256x128xbf16>, vector<128x128xf32> -> vector<128x128xf32>
    %c0_26 = arith.constant 0 : index
    %c0_27 = arith.constant 0 : index
    %44 = vector.load %arg10[%c0_26, %c0_27] : memref<1x128xf32, #tpu.memory_space<vmem>>, vector<1x128xf32>
    %45 = vector.broadcast %44 : vector<1x128xf32> to vector<128x128xf32>
    %46 = arith.addf %43, %45 : vector<128x128xf32>
    %47 = math.tanh %46 : vector<128x128xf32>
    %c0_28 = arith.constant 0 : index
    %c0_29 = arith.constant 0 : index
    %48 = vector.load %arg11[%c0_28, %c0_29] : memref<128x128xf32, #tpu.memory_space<vmem>>, vector<128x128xf32>
    tpu.vector_store %arg11[%c0_28, %c0_29], %47 {strides = array<i32>} : memref<128x128xf32, #tpu.memory_space<vmem>>, vector<128x128xf32>,
    return
  }
  func.func @transform_0(%arg0: i32) -> (i32, i32) {
    %c0_i32 = arith.constant 0 : i32
    %c0_i32_0 = arith.constant 0 : i32
    %c0_i32_1 = arith.constant 0 : i32
    return %c0_i32, %c0_i32_0 : i32, i32
  }
  func.func @transform_1(%arg0: i32) -> (i32, i32) {
    %c0_i32 = arith.constant 0 : i32
    %c0_i32_0 = arith.constant 0 : i32
    %c0_i32_1 = arith.constant 0 : i32
    return %c0_i32, %c0_i32_0 : i32, i32
  }
  func.func @transform_2(%arg0: i32) -> (i32, i32) {
    %c0_i32 = arith.constant 0 : i32
    %c0_i32_0 = arith.constant 0 : i32
    %c0_i32_1 = arith.constant 0 : i32
    return %c0_i32, %c0_i32_0 : i32, i32
  }
  func.func @transform_3(%arg0: i32) -> (i32, i32) {
    %c0_i32 = arith.constant 0 : i32
    %c0_i32_0 = arith.constant 0 : i32
    return %arg0, %c0_i32 : i32, i32
  }
  func.func @transform_4(%arg0: i32) -> (i32, i32) {
    %c0_i32 = arith.constant 0 : i32
    %c0_i32_0 = arith.constant 0 : i32
    %c0_i32_1 = arith.constant 0 : i32
    return %c0_i32, %c0_i32_0 : i32, i32
  }
  func.func @transform_5(%arg0: i32) -> (i32, i32) {
    %c0_i32 = arith.constant 0 : i32
    %c0_i32_0 = arith.constant 0 : i32
    %c0_i32_1 = arith.constant 0 : i32
    return %c0_i32, %c0_i32_0 : i32, i32
  }
  func.func @transform_6(%arg0: i32) -> (i32, i32) {
    %c0_i32 = arith.constant 0 : i32
    %c0_i32_0 = arith.constant 0 : i32
    %c0_i32_1 = arith.constant 0 : i32
    return %c0_i32, %c0_i32_0 : i32, i32
  }
  func.func @transform_7(%arg0: i32) -> (i32, i32) {
    %c0_i32 = arith.constant 0 : i32
    %c0_i32_0 = arith.constant 0 : i32
    %c0_i32_1 = arith.constant 0 : i32
    return %c0_i32, %c0_i32_0 : i32, i32
  }
  func.func @transform_8(%arg0: i32) -> (i32, i32) {
    %c0_i32 = arith.constant 0 : i32
    %c0_i32_0 = arith.constant 0 : i32
    %c0_i32_1 = arith.constant 0 : i32
    return %c0_i32, %c0_i32_0 : i32, i32
  }
  func.func @transform_9(%arg0: i32) -> (i32, i32) {
    %c0_i32 = arith.constant 0 : i32
    %c0_i32_0 = arith.constant 0 : i32
    %c0_i32_1 = arith.constant 0 : i32
    return %c0_i32, %c0_i32_0 : i32, i32
  }
  func.func @transform_10(%arg0: i32) -> (i32, i32) {
    %c0_i32 = arith.constant 0 : i32
    %c0_i32_0 = arith.constant 0 : i32
    return %arg0, %c0_i32 : i32, i32
  }
}

</mosaic_0001>

<bundles_post_ra>
// kernel: tpu_custom_call.1
= control target key start
LH: loop header
LB: loop body
LE: loop exit
PB: predicated region body
PF: predicated region fallthrough
CT: control target
= control target key end

     0   :  { %15 = vsyncpa [#allocation3], 0  ;;  %s3642_s0 = inlined_call_operand.vmem [shape: f32[256,32], index: 0, kind: input, shape index: {}]   ;;  %s3643_s1 = inlined_call_operand.vmem [shape: f32[1,32], index: 1, kind: input, shape index: {}]   ;;  %s3644_s2 = inlined_call_operand.vmem [shape: f32[1,32], index: 2, kind: input, shape index: {}]   ;;  %s3645_s3 = inlined_call_operand.vmem [shape: f32[256,32], index: 3, kind: input, shape index: {}]   ;;  %s3646_s4 = inlined_call_operand.hbm [shape: bf16[32,512], index: 4, kind: input, shape index: {}]   ;;  %s3647_s5 = inlined_call_operand.vmem [shape: f32[1,512], index: 5, kind: input, shape index: {}]   ;;  %s3648_s6 = inlined_call_operand.vmem [shape: bf16[512,256], index: 6, kind: input, shape index: {}]   ;;  %s3649_s7 = inlined_call_operand.vmem [shape: f32[1,256], index: 7, kind: input, shape index: {}]   ;;  %s3650_s8 = inlined_call_operand.vmem [shape: bf16[256,128], index: 8, kind: input, shape index: {}]   ;;  %s3651_s9 = inlined_call_operand.vmem [shape: f32[1,128], index: 9, kind: input, shape index: {}]   ;;  %s3652_s10 = inlined_call_operand.hbm [shape: f32[256,128], index: 10, kind: output, shape index: {}]  }
   0x1   :  { %16 = vsyncpa [#allocation4], 0 }
   0x2   :  { %18 = vsyncpa [#allocation4 + $0x1], 0  ;;  %s2694_s13 = smov 0   ;;  %s2696_s14 = smov 0  }
   0x3   :  { %s2698_s15 = smov 0   ;;  %s2700_s16 = smov 0  }
   0x4 LB: > { %s2715_s17 = sadd.s32 4294967295, %s2630_s16   ;;  %s2127_s18 = sadd.s32 4294967294, %s2630_s16   ;;  %s2630_s16 = sphi %s2700_s16, %s3660_s16   ;;  %s2626_s15 = sphi %s2698_s15, %s3659_s15   ;;  %s2622_s14 = sphi %s2696_s14, %s3658_s14   ;;  %s2618_s13 = sphi %s2694_s13, %s3657_s13  }
   0x5   : > { %s2719_s19 = sadd.s32 1, %s2630_s16   ;;  %s246_s20 = sadd.s32 1, %s2626_s15 }
   0x6   : > { %s243_s21 = ssub.s32 %s2630_s16, %s2719_s19  ;;  %p256_p0 = scmp.ne.s32.totalorder %s2626_s15, %s2622_s14 }
   0x7   : > { %p244_p1 = scmp.eq.s32.totalorder %s243_s21, 0  ;;  %p257_p2 = scmp.eq.s32.totalorder %s2715_s17, 1 }
   0x8   : > { %p262_p3 = scmp.ne.s32.totalorder %s2622_s14, %s2618_s13  ;;  %p263_p4 = scmp.eq.s32.totalorder %s2127_s18, 1 }
   0x9   : > { %s2730_s22 = scalar_select %p244_p1, %s2626_s15, %s246_s20  }
   0xa   : > { %p2732_p5 = por %p257_p2, %p256_p0  ;;  %p2736_p6 = por %p263_p4, %p262_p3 }
   0xb   : > { %p2128_p7 = scmp.ge.s32.totalorder %s2630_s16, 1  ;;  %p270_p8 = scmp.lt.s32.totalorder %s2630_s16, 3 }
   0xc   : > { %s3654_s24 = scalar_select %p2736_p6, 1, 0 }
   0xd   : > { %p2341_p9 = scmp.eq.s32.totalorder %s2715_s17, 0  ;;  %p2743_p10 = pnand %p2128_p7, %p270_p8 }
   0xe   : > { %s2632_s26 = smov [#allocation2]  }
   0xf   : > { %s291_s27 = sshll.u32 %s2632_s26, 4  ;;  %p2333_p11 = pneg %p2743_p10  ;;  %s292_s27 = int_to_ptr.vmem [resolvable:$true] %s291_s27 }
  0x10   : > { %s2551_s28 = scalar_lea.vmem %s292_s27, 1024  ;;  %p2559_p3 = scmp.lt.s32.totalorder %s292_s27, %s292_s27 }
  0x11   : > { %p2334_p12 = pnand %p2341_p9, %p2333_p11  ;;  %p2552_p0 = scmp.ne.s32.totalorder %s292_s27, %s2551_s28 }
  0x12   : > { %p2560_p4 = scmp.lt.s32.totalorder %s2551_s28, %s2551_s28 }
  0x13   : > { %p2542_p13 = pneg %p2334_p12 }
  0x14   : > { %p2561_p6 = por %p2560_p4, %p2559_p3 }
  0x15   : > { %p2554_p1 = pnand %p2552_p0, %p2542_p13 }
  0x17   : > { %p2555_p2 = pneg %p2554_p1 }
  0x19   : > { %p2562_p7 = pnand %p2561_p6, %p2555_p2 }
  0x1b   : > { %2565 = shalt.err (!%p2562_p7)
}
  0x1c   : > { %s2633_s29 = smov 256   ;;  %s2634_s30 = smov 16  }
  0x1d   : > { %2336 = dma.hbm_to_vmem [thread:$0]  (!%p2334_p12), %s3646_s4, 1024, %s292_s27, [#allocation3], %s2633_s29, %s2633_s29, %s2634_s30  }
  0x1e   : > { %331 = sbr.rel (%p2743_p10) target bundleno = 928 (0x3a0), region = 60 }
  0x23   : > { %2609 = dma.done.wait (%p2341_p9), [#allocation3], 1024  }
  0x24   : > { %2611 = vsyncadd (%p2341_p9), [#allocation3], 4294966272  ;;  %v2635_v0 = vmov 0   ;;  %v2382_v1 = vld [vmem:[#allocation2 + $0x24] ss:$16 sps:$4 sm:$0xff]   ;;  %vm409_vm0 = vcmask 261120  }
  0x25   : > { %815 = vmatprep.mubr.bf16.mxu0 %v2635_v0  ;;  %928 = vmatprep.mubr.bf16.mxu1 %v2635_v0  ;;  %v2384_v2 = vld [vmem:[#allocation2 + $0x2c] ss:$16 sps:$4 sm:$0xff]   ;;  %v2386_v3 = vld [vmem:[#allocation2 + $0x20] ss:$16 sps:$4 sm:$0xff]   ;;  %v2387_v4 = vld [vmem:[#allocation2 + $0x28] ss:$16 sps:$4 sm:$0xff]  }
  0x26   : > { %795 = vmatprep.subr.bf16.mxu0 %v2382_v1  ;;  %908 = vmatprep.subr.bf16.mxu1 %v2384_v2  ;;  %v2388_v5 = vld [vmem:[#allocation2 + $0x4] ss:$16 sps:$4 sm:$0xff]   ;;  %v2390_v6 = vld [vmem:[#allocation2 + $0xc] ss:$16 sps:$4 sm:$0xff]   ;;  %v2392_v7 = vld [vmem:[#allocation2] ss:$16 sps:$4 sm:$0xff]  }
  0x27   : > { %796 = vmatpush1.bf16.msra.mxu0 %v2386_v3  ;;  %909 = vmatpush1.bf16.msra.mxu1 %v2387_v4  ;;  %v2393_v8 = vld [vmem:[#allocation2 + $0x8] ss:$16 sps:$4 sm:$0xff]   ;;  %v2765_v9 = vld [vmem:[%s3642_s0] sm:$0xff]  ;;  %v2775_v11 = vld [vmem:[%s3642_s0 + $0x10] sm:$0xff]  ;;  %s2134_s21 = sshll.u32 %s2715_s17, 4  ;;  %s2246_s11 = sshll.u32 %s2715_s17, 11 }
  0x28   : > { %797 = vmatprep.subr.bf16.mxu0 %v2388_v5  ;;  %v2770_v10 = vld [vmem:[%s3642_s0 + $0x8] sm:$0xff]  ;;  %910 = vmatprep.subr.bf16.mxu1 %v2390_v6  ;;  %v2780_v12 = vld [vmem:[%s3642_s0 + $0x18] sm:$0xff]  ;;  %v410_v13 = vsel %vm409_vm0, %v2765_v9, 0.0  ;;  %v2789_v15 = vld [vmem:[%s3642_s0 + $0x20] sm:$0xff]  ;;  %v413_v17 = vsel %vm409_vm0, %v2775_v11, 0.0  ;;  %p370_p6 = scmp.lt.s32.totalorder %s2134_s21, 31 }
  0x29   : > { %v411_v14 = vsel %vm409_vm0, %v2770_v10, 0.0  ;;  %v415_v18 = vsel %vm409_vm0, %v2780_v12, 0.0  ;;  %v2798_v19 = vld [vmem:[%s3642_s0 + $0x28] sm:$0xff]  ;;  %v417_v21 = vsel %vm409_vm0, %v2789_v15, 0.0  ;;  %v2805_v22 = vld [vmem:[%s3642_s0 + $0x30] sm:$0xff]  ;;  %v2812_v25 = vld [vmem:[%s3642_s0 + $0x38] sm:$0xff] }
  0x2a   : > { %v412_v16 = vadd.f32 %v411_v14, %v410_v13  ;;  %v419_v24 = vsel %vm409_vm0, %v2798_v19, 0.0  ;;  %v421_v27 = vsel %vm409_vm0, %v2805_v22, 0.0  ;;  %v2819_v28 = vld [vmem:[%s3642_s0 + $0x40] sm:$0xff]  ;;  %v2824_v29 = vld [vmem:[%s3642_s0 + $0x48] sm:$0xff]  ;;  %v423_v31 = vsel %vm409_vm0, %v2812_v25, 0.0  ;;  %v2831_v32 = vld [vmem:[%s3642_s0 + $0x50] sm:$0xff] }
  0x2b   : > { %798 = vmatpush1.bf16.msra.mxu0 %v2392_v7  ;;  %911 = vmatpush1.bf16.msra.mxu1 %v2393_v8  ;;  %v425_v34 = vsel %vm409_vm0, %v2819_v28, 0.0  ;;  %v2838_v35 = vld [vmem:[%s3642_s0 + $0x58] sm:$0xff]  ;;  %v427_v37 = vsel %vm409_vm0, %v2824_v29, 0.0  ;;  %v2845_v38 = vld [vmem:[%s3642_s0 + $0x60] sm:$0xff]  ;;  %v429_v40 = vsel %vm409_vm0, %v2831_v32, 0.0  ;;  %v2852_v41 = vld [vmem:[%s3642_s0 + $0x68] sm:$0xff] }
  0x2c   : > { %v414_v20 = vadd.f32 %v413_v17, %v412_v16  ;;  %v431_v43 = vsel %vm409_vm0, %v2838_v35, 0.0  ;;  %v2859_v44 = vld [vmem:[%s3642_s0 + $0x70] sm:$0xff]  ;;  %v433_v46 = vsel %vm409_vm0, %v2845_v38, 0.0  ;;  %v2866_v47 = vld [vmem:[%s3642_s0 + $0x78] sm:$0xff]  ;;  %v435_v49 = vsel %vm409_vm0, %v2852_v41, 0.0  ;;  %v2873_v50 = vld [vmem:[%s3642_s0 + $0x80] sm:$0xff] }
  0x2d   : > { %v2878_v52 = vld [vmem:[%s3642_s0 + $0x88] sm:$0xff]  ;;  %v437_v53 = vsel %vm409_vm0, %v2859_v44, 0.0  ;;  %v2885_v54 = vld [vmem:[%s3642_s0 + $0x90] sm:$0xff]  ;;  %v2890_v55 = vld [vmem:[%s3642_s0 + $0x98] sm:$0xff]  ;;  %v439_v59 = vsel %vm409_vm0, %v2866_v47, 0.0  ;;  %v441_v61 = vsel %vm409_vm0, %v2873_v50, 0.0 }
  0x2e   : > { %v416_v23 = vadd.f32 %v415_v18, %v414_v20  ;;  %v2895_v56 = vld [vmem:[%s3642_s0 + $0xa0] sm:$0xff]  ;;  %v2900_v58 = vld [vmem:[%s3642_s0 + $0xa8] sm:$0xff]  ;;  %v443_v63 = vsel %vm409_vm0, %v2878_v52, 0.0  ;;  %v445_v1 = vsel %vm409_vm0, %v2885_v54, 0.0  ;;  %v447_v2 = vsel %vm409_vm0, %v2890_v55, 0.0  ;;  %v2919_v7 = vld [vmem:[%s3642_s0 + $0xb0] sm:$0xff] }
  0x2f   : > { %v449_v3 = vsel %vm409_vm0, %v2895_v56, 0.0  ;;  %v451_v5 = vsel %vm409_vm0, %v2900_v58, 0.0  ;;  %v2924_v13 = vld [vmem:[%s3642_s0 + $0xb8] sm:$0xff]  ;;  %v2929_v17 = vld [vmem:[%s3642_s0 + $0xc0] sm:$0xff]  ;;  %v453_v18 = vsel %vm409_vm0, %v2919_v7, 0.0  ;;  %s3662_s21 = smov (!%p370_p6, %s2134_s21), 31 }
  0x30   : > { %v418_v26 = vadd.f32 %v417_v21, %v416_v23  ;;  %v455_v21 = vsel %vm409_vm0, %v2924_v13, 0.0  ;;  %v2938_v23 = vld [vmem:[%s3642_s0 + $0xc8] sm:$0xff]  ;;  %s2135_s25 = sshll.u32 %s3662_s21, 3  ;;  %s3595_s21 = scalar_lea.hbm %s3652_s10, %s2246_s11 }
  0x31   : > { %s3099_s30 = scalar_lea.vmem %s3645_s3, %s2135_s25  ;;  %s2636_s17 = smov [#allocation5]  }
  0x32   : > { %v420_v30 = vadd.f32 %v419_v24, %v418_v26  ;;  %v457_v26 = vsel %vm409_vm0, %v2929_v17, 0.0  ;;  %s2570_s27 = sshll.u32 %s2636_s17, 4  ;;  %s2571_s27 = int_to_ptr.vmem [resolvable:$false] %s2570_s27 }
  0x34   : > { %v422_v33 = vadd.f32 %v421_v27, %v420_v30  ;;  %v2945_v27 = vld [vmem:[%s3642_s0 + $0xd0] sm:$0xff] }
  0x36   : > { %v424_v36 = vadd.f32 %v423_v31, %v422_v33  ;;  %v459_v31 = vsel %vm409_vm0, %v2938_v23, 0.0  ;;  %v2952_v33 = vld [vmem:[%s3642_s0 + $0xd8] sm:$0xff] }
  0x38   : > { %v426_v39 = vadd.f32 %v425_v34, %v424_v36  ;;  %v461_v36 = vsel %vm409_vm0, %v2945_v27, 0.0 }
  0x3a   : > { %v428_v42 = vadd.f32 %v427_v37, %v426_v39  ;;  %v2959_v37 = vld [vmem:[%s3642_s0 + $0xe0] sm:$0xff] }
  0x3c   : > { %v430_v45 = vadd.f32 %v429_v40, %v428_v42  ;;  %v463_v40 = vsel %vm409_vm0, %v2952_v33, 0.0  ;;  %v2966_v42 = vld [vmem:[%s3642_s0 + $0xe8] sm:$0xff] }
  0x3e   : > { %v432_v48 = vadd.f32 %v431_v43, %v430_v45  ;;  %v465_v45 = vsel %vm409_vm0, %v2959_v37, 0.0 }
  0x40   : > { %v434_v51 = vadd.f32 %v433_v46, %v432_v48  ;;  %v2973_v46 = vld [vmem:[%s3642_s0 + $0xf0] sm:$0xff] }
  0x42   : > { %v436_v57 = vadd.f32 %v435_v49, %v434_v51  ;;  %v467_v49 = vsel %vm409_vm0, %v2966_v42, 0.0  ;;  %v2980_v51 = vld [vmem:[%s3642_s0 + $0xf8] sm:$0xff] }
  0x44   : > { %v438_v60 = vadd.f32 %v437_v53, %v436_v57  ;;  %v469_v57 = vsel %vm409_vm0, %v2973_v46, 0.0 }
  0x46   : > { %v440_v62 = vadd.f32 %v439_v59, %v438_v60  ;;  %v471_v60 = vsel %vm409_vm0, %v2980_v51, 0.0 }
  0x48   : > { %v442_v4 = vadd.f32 %v441_v61, %v440_v62 }
  0x4a   : > { %v444_v6 = vadd.f32 %v443_v63, %v442_v4 }
  0x4c   : > { %v446_v8 = vadd.f32 %v445_v1, %v444_v6 }
  0x4e   : > { %v448_v14 = vadd.f32 %v447_v2, %v446_v8 }
  0x50   : > { %v450_v16 = vadd.f32 %v449_v3, %v448_v14 }
  0x52   : > { %v452_v20 = vadd.f32 %v451_v5, %v450_v16 }
  0x54   : > { %v454_v24 = vadd.f32 %v453_v18, %v452_v20 }
  0x56   : > { %v456_v30 = vadd.f32 %v455_v21, %v454_v24 }
  0x58   : > { %v458_v34 = vadd.f32 %v457_v26, %v456_v30 }
  0x5a   : > { %v460_v39 = vadd.f32 %v459_v31, %v458_v34 }
  0x5c   : > { %v462_v43 = vadd.f32 %v461_v36, %v460_v39 }
  0x5e   : > { %v464_v48 = vadd.f32 %v463_v40, %v462_v43 }
  0x60   : > { %v466_v53 = vadd.f32 %v465_v45, %v464_v48 }
  0x62   : > { %v468_v59 = vadd.f32 %v467_v49, %v466_v53 }
  0x64   : > { %v470_v61 = vadd.f32 %v469_v57, %v468_v59 }
  0x66   : > { %v472_v62 = vadd.f32 %v471_v60, %v470_v61 }
  0x68   : > { %v473_v63 = vrot.slane %v472_v62, 4 }
  0x6a   : > { %v474_v1 = vadd.f32 %v473_v63, %v472_v62 }
  0x6c   : > { %v475_v2 = vrot.slane %v474_v1, 2 }
  0x6e   : > { %v476_v3 = vadd.f32 %v475_v2, %v474_v1 }
  0x70   : > { %v477_v4 = vrot.slane %v476_v3, 1 }
  0x72   : > { %v478_v5 = vadd.f32 %v477_v4, %v476_v3 }
  0x74   : > { %v2986_v6 = vmul.f32 0.00390625, %v478_v5 }
  0x76   : > { %v480_v8 = vsub.f32 %v2765_v9, %v2986_v6  ;;  %v481_v14 = vsub.f32 %v2770_v10, %v2986_v6  ;;  %v482_v16 = vsub.f32 %v2775_v11, %v2986_v6  ;;  %v483_v18 = vsub.f32 %v2780_v12, %v2986_v6 }
  0x77   : > { %v484_v20 = vsub.f32 %v2789_v15, %v2986_v6  ;;  %v485_v30 = vsub.f32 %v2798_v19, %v2986_v6  ;;  %v486_v9 = vsub.f32 %v2805_v22, %v2986_v6  ;;  %v487_v15 = vsub.f32 %v2812_v25, %v2986_v6 }
  0x78   : > { %v512_v21 = vmul.f32 %v480_v8, %v480_v8  ;;  %v513_v24 = vmul.f32 %v481_v14, %v481_v14  ;;  %v514_v26 = vmul.f32 %v482_v16, %v482_v16  ;;  %v515_v31 = vmul.f32 %v483_v18, %v483_v18 }
  0x79   : > { %v516_v10 = vmul.f32 %v484_v20, %v484_v20  ;;  %v517_v39 = vmul.f32 %v485_v30, %v485_v30  ;;  %v488_v19 = vsub.f32 %v2819_v28, %v2986_v6  ;;  %v518_v45 = vmul.f32 %v486_v9, %v486_v9 }
  0x7a   : > { %v544_v34 = vsel %vm409_vm0, %v512_v21, 0.0  ;;  %v545_v11 = vsel %vm409_vm0, %v513_v24, 0.0  ;;  %v547_v12 = vsel %vm409_vm0, %v514_v26, 0.0  ;;  %v549_v40 = vsel %vm409_vm0, %v515_v31, 0.0 }
  0x7b   : > { %v546_v36 = vadd.f32 %v545_v11, %v544_v34  ;;  %v551_v22 = vsel %vm409_vm0, %v516_v10, 0.0  ;;  %v489_v49 = vsub.f32 %v2824_v29, %v2986_v6  ;;  %v519_v53 = vmul.f32 %v487_v15, %v487_v15 }
  0x7c   : > { %v553_v57 = vsel %vm409_vm0, %v517_v39, 0.0  ;;  %v490_v25 = vsub.f32 %v2831_v32, %v2986_v6  ;;  %v520_v60 = vmul.f32 %v488_v19, %v488_v19  ;;  %v555_v61 = vsel %vm409_vm0, %v518_v45, 0.0 }
  0x7d   : > { %v548_v43 = vadd.f32 %v547_v12, %v546_v36  ;;  %v491_v28 = vsub.f32 %v2838_v35, %v2986_v6  ;;  %v521_v63 = vmul.f32 %v489_v49, %v489_v49  ;;  %v557_v1 = vsel %vm409_vm0, %v519_v53, 0.0 }
  0x7e   : > { %v492_v29 = vsub.f32 %v2845_v38, %v2986_v6  ;;  %v522_v3 = vmul.f32 %v490_v25, %v490_v25  ;;  %v559_v4 = vsel %vm409_vm0, %v520_v60, 0.0  ;;  %v493_v32 = vsub.f32 %v2852_v41, %v2986_v6 }
  0x7f   : > { %v550_v48 = vadd.f32 %v549_v40, %v548_v43  ;;  %v523_v8 = vmul.f32 %v491_v28, %v491_v28  ;;  %v561_v14 = vsel %vm409_vm0, %v521_v63, 0.0  ;;  %v494_v35 = vsub.f32 %v2859_v44, %v2986_v6  ;;  %v2399_v28 = vld [vmem:[%s3648_s6 + $0x174] ss:$8 sps:$4 sm:$0xff]  }
  0x80   : > { %v524_v18 = vmul.f32 %v492_v29, %v492_v29  ;;  %v563_v20 = vsel %vm409_vm0, %v522_v3, 0.0  ;;  %v495_v38 = vsub.f32 %v2866_v47, %v2986_v6  ;;  %v525_v24 = vmul.f32 %v493_v32, %v493_v32  ;;  %1614 = vmatprep.subr.bf16.mxu1 %v2399_v28 }
  0x81   : > { %v552_v59 = vadd.f32 %v551_v22, %v550_v48  ;;  %v565_v26 = vsel %vm409_vm0, %v523_v8, 0.0  ;;  %v496_v41 = vsub.f32 %v2873_v50, %v2986_v6  ;;  %v526_v31 = vmul.f32 %v494_v35, %v494_v35 }
  0x82   : > { %v567_v9 = vsel %vm409_vm0, %v524_v18, 0.0  ;;  %v497_v44 = vsub.f32 %v2878_v52, %v2986_v6  ;;  %v527_v34 = vmul.f32 %v495_v38, %v495_v38  ;;  %v569_v11 = vsel %vm409_vm0, %v525_v24, 0.0 }
  0x83   : > { %v554_v62 = vadd.f32 %v553_v57, %v552_v59  ;;  %v498_v47 = vsub.f32 %v2885_v54, %v2986_v6  ;;  %v528_v36 = vmul.f32 %v496_v41, %v496_v41  ;;  %v571_v15 = vsel %vm409_vm0, %v526_v31, 0.0 }
  0x84   : > { %v499_v50 = vsub.f32 %v2890_v55, %v2986_v6  ;;  %v529_v40 = vmul.f32 %v497_v44, %v497_v44  ;;  %v573_v43 = vsel %vm409_vm0, %v527_v34, 0.0  ;;  %v500_v52 = vsub.f32 %v2895_v56, %v2986_v6  ;;  %v2396_v56 = vld [vmem:[%s3648_s6 + $0x74] ss:$8 sps:$4 sm:$0xff]  }
  0x85   : > { %v556_v2 = vadd.f32 %v555_v61, %v554_v62  ;;  %v530_v45 = vmul.f32 %v498_v47, %v498_v47  ;;  %v575_v22 = vsel %vm409_vm0, %v528_v36, 0.0  ;;  %v501_v54 = vsub.f32 %v2900_v58, %v2986_v6  ;;  %1501 = vmatprep.subr.bf16.mxu0 %v2396_v56 }
  0x86   : > { %v531_v49 = vmul.f32 %v499_v50, %v499_v50  ;;  %v577_v53 = vsel %vm409_vm0, %v529_v40, 0.0  ;;  %v502_v55 = vsub.f32 %v2919_v7, %v2986_v6  ;;  %v532_v59 = vmul.f32 %v500_v52, %v500_v52 }
  0x87   : > { %v558_v5 = vadd.f32 %v557_v1, %v556_v2  ;;  %v579_v25 = vsel %vm409_vm0, %v530_v45, 0.0  ;;  %v503_v61 = vsub.f32 %v2924_v13, %v2986_v6  ;;  %v533_v62 = vmul.f32 %v501_v54, %v501_v54 }
  0x88   : > { %v581_v58 = vsel %vm409_vm0, %v531_v49, 0.0  ;;  %v504_v7 = vsub.f32 %v2929_v17, %v2986_v6  ;;  %v534_v1 = vmul.f32 %v502_v55, %v502_v55  ;;  %v583_v2 = vsel %vm409_vm0, %v532_v59, 0.0  ;;  %v614_v59 = vld [vmem:[%s3643_s1] sm:$0x1] }
  0x89   : > { %v560_v16 = vadd.f32 %v559_v4, %v558_v5  ;;  %v505_v13 = vsub.f32 %v2938_v23, %v2986_v6  ;;  %v535_v3 = vmul.f32 %v503_v61, %v503_v61  ;;  %v585_v4 = vsel %vm409_vm0, %v533_v62, 0.0  ;;  %v618_v61 = vld [vmem:[%s3644_s2] sm:$0x1] }
  0x8a   : > { %v506_v32 = vsub.f32 %v2945_v27, %v2986_v6  ;;  %v536_v8 = vmul.f32 %v504_v7, %v504_v7  ;;  %v507_v17 = vsub.f32 %v2952_v33, %v2986_v6  ;;  %v508_v23 = vsub.f32 %v2959_v37, %v2986_v6  ;;  %v621_v62 = vld [vmem:[%s3099_s30] sm:$0xff] }
  0x8b   : > { %v562_v21 = vadd.f32 %v561_v14, %v560_v16  ;;  %v587_v14 = vsel %vm409_vm0, %v534_v1, 0.0  ;;  %v537_v35 = vmul.f32 %v505_v13, %v505_v13  ;;  %v589_v18 = vsel %vm409_vm0, %v535_v3, 0.0  ;;  %v624_v13 = vld [vmem:[%s3099_s30 + $0x18] sm:$0xff] }
  0x8c   : > { %v591_v38 = vsel %vm409_vm0, %v536_v8, 0.0  ;;  %v509_v27 = vsub.f32 %v2966_v42, %v2986_v6  ;;  %v510_v33 = vsub.f32 %v2973_v46, %v2986_v6  ;;  %v540_v31 = vmul.f32 %v508_v23, %v508_v23  ;;  %v625_v23 = vld [vmem:[%s3099_s30 + $0x20] sm:$0xff] }
  0x8d   : > { %v564_v30 = vadd.f32 %v563_v20, %v562_v21  ;;  %v538_v21 = vmul.f32 %v506_v32, %v506_v32  ;;  %v511_v37 = vsub.f32 %v2980_v51, %v2986_v6 }
  0x8e   : > { %v541_v44 = vmul.f32 %v509_v27, %v509_v27  ;;  %v599_v42 = vsel %vm409_vm0, %v540_v31, 0.0  ;;  %v2408_v27 = vld [vmem:[%s3648_s6 + $0x54] ss:$8 sps:$4 sm:$0xff]   ;;  %v2406_v31 = vld [vmem:[%s3648_s6 + $0x50] ss:$8 sps:$4 sm:$0xff]  }
  0x8f   : > { %v566_v10 = vadd.f32 %v565_v26, %v564_v30  ;;  %v539_v26 = vmul.f32 %v507_v17, %v507_v17  ;;  %v593_v30 = vsel %vm409_vm0, %v537_v35, 0.0  ;;  %v543_v36 = vmul.f32 %v511_v37, %v511_v37  ;;  %v2402_v17 = vld [vmem:[%s3648_s6 + $0x64] ss:$8 sps:$4 sm:$0xff]  }
  0x90   : > { %v2405_v35 = vld [vmem:[%s3648_s6 + $0x164] ss:$8 sps:$4 sm:$0xff]  }
  0x91   : > { %v568_v12 = vadd.f32 %v567_v9, %v566_v10  ;;  %v595_v9 = vsel %vm409_vm0, %v538_v21, 0.0  ;;  %v597_v34 = vsel %vm409_vm0, %v539_v26, 0.0  ;;  %v605_v40 = vsel %vm409_vm0, %v543_v36, 0.0  ;;  %v626_v21 = vld [vmem:[%s3099_s30 + $0x28] sm:$0xff]  ;;  %v2411_v26 = vld [vmem:[%s3648_s6 + $0x154] ss:$8 sps:$4 sm:$0xff]  }
  0x92   : > { %v2417_v37 = vld [vmem:[%s3648_s6 + $0x144] ss:$8 sps:$4 sm:$0xff]   ;;  %v2420_v36 = vld [vmem:[%s3648_s6 + $0x34] ss:$8 sps:$4 sm:$0xff]  }
  0x93   : > { %v570_v39 = vadd.f32 %v569_v11, %v568_v12  ;;  %v542_v12 = vmul.f32 %v510_v33, %v510_v33 }
  0x95   : > { %v572_v19 = vadd.f32 %v571_v15, %v570_v39  ;;  %v601_v15 = vsel %vm409_vm0, %v541_v44, 0.0  ;;  %v603_v39 = vsel %vm409_vm0, %v542_v12, 0.0  ;;  %v628_v12 = vld [vmem:[%s3099_s30 + $0x38] sm:$0xff] }
  0x97   : > { %v574_v48 = vadd.f32 %v573_v43, %v572_v19 }
  0x99   : > { %v576_v57 = vadd.f32 %v575_v22, %v574_v48 }
  0x9b   : > { %v578_v60 = vadd.f32 %v577_v53, %v576_v57  ;;  %v638_v57 = vlaneseq }
  0x9d   : > { %v580_v63 = vadd.f32 %v579_v25, %v578_v60  ;;  %v3091_v55 = vshrl.u32 %v638_v57, 7  ;;  %v2435_v57 = vld [vmem:[%s3648_s6 + $0x114] ss:$8 sps:$4 sm:$0xff]  }
  0x9f   : > { %v582_v29 = vadd.f32 %v581_v58, %v580_v63  ;;  %v3102_v25 = vsub.s32 0, %v3091_v55  ;;  %v622_v58 = vld [vmem:[%s3099_s30 + $0x8] sm:$0xff] }
  0xa1   : > { %v584_v5 = vadd.f32 %v583_v2, %v582_v29  ;;  %v623_v29 = vld [vmem:[%s3099_s30 + $0x10] sm:$0xff] }
  0xa3   : > { %v586_v16 = vadd.f32 %v585_v4, %v584_v5 }
  0xa5   : > { %v588_v20 = vadd.f32 %v587_v14, %v586_v16  ;;  %v2394_v14 = vld [vmem:[%s3648_s6 + $0x70] ss:$8 sps:$4 sm:$0xff]  }
  0xa6   : > { %v2397_v16 = vld [vmem:[%s3648_s6 + $0x170] ss:$8 sps:$4 sm:$0xff]  }
  0xa7   : > { %v590_v24 = vadd.f32 %v589_v18, %v588_v20 }
  0xa9   : > { %v592_v41 = vadd.f32 %v591_v38, %v590_v24  ;;  %v2400_v38 = vld [vmem:[%s3648_s6 + $0x60] ss:$8 sps:$4 sm:$0xff]  }
  0xaa   : > { %v2403_v24 = vld [vmem:[%s3648_s6 + $0x160] ss:$8 sps:$4 sm:$0xff]  }
  0xab   : > { %v594_v10 = vadd.f32 %v593_v30, %v592_v41 }
  0xad   : > { %v596_v11 = vadd.f32 %v595_v9, %v594_v10  ;;  %v2409_v9 = vld [vmem:[%s3648_s6 + $0x150] ss:$8 sps:$4 sm:$0xff]   ;;  %v2414_v10 = vld [vmem:[%s3648_s6 + $0x44] ss:$8 sps:$4 sm:$0xff]  }
  0xaf   : > { %v598_v47 = vadd.f32 %v597_v34, %v596_v11  ;;  %v627_v11 = vld [vmem:[%s3099_s30 + $0x30] sm:$0xff] }
  0xb1   : > { %v600_v46 = vadd.f32 %v599_v42, %v598_v47  ;;  %v2412_v42 = vld [vmem:[%s3648_s6 + $0x40] ss:$8 sps:$4 sm:$0xff]  }
  0xb2   : > { %v2415_v47 = vld [vmem:[%s3648_s6 + $0x140] ss:$8 sps:$4 sm:$0xff]  }
  0xb3   : > { %v602_v50 = vadd.f32 %v601_v15, %v600_v46  ;;  %v2423_v15 = vld [vmem:[%s3648_s6 + $0x134] ss:$8 sps:$4 sm:$0xff]  }
  0xb5   : > { %v604_v43 = vadd.f32 %v603_v39, %v602_v50 }
  0xb7   : > { %v606_v51 = vadd.f32 %v605_v40, %v604_v43  ;;  %v2418_v40 = vld [vmem:[%s3648_s6 + $0x30] ss:$8 sps:$4 sm:$0xff]  }
  0xb8   : > { %v2421_v43 = vld [vmem:[%s3648_s6 + $0x130] ss:$8 sps:$4 sm:$0xff]  }
  0xb9   : > { %v607_v19 = vrot.slane %v606_v51, 4 }
  0xbb   : > { %v608_v52 = vadd.f32 %v607_v19, %v606_v51  ;;  %v2426_v51 = vld [vmem:[%s3648_s6 + $0x24] ss:$8 sps:$4 sm:$0xff]  }
  0xbc   : > { %v2429_v19 = vld [vmem:[%s3648_s6 + $0x124] ss:$8 sps:$4 sm:$0xff]  }
  0xbd   : > { %v609_v45 = vrot.slane %v608_v52, 2 }
  0xbf   : > { %v610_v22 = vadd.f32 %v609_v45, %v608_v52 }
  0xc1   : > { %v611_v48 = vrot.slane %v610_v22, 1 }
  0xc3   : > { %v612_v54 = vadd.f32 %v611_v48, %v610_v22  ;;  %v629_v22 = vld [vmem:[%s3099_s30 + $0x40] sm:$0xff]  ;;  %v630_v48 = vld [vmem:[%s3099_s30 + $0x48] sm:$0xff] }
  0xc5   : > { %v613_v49 = vmul.f32 0.00390625, %v612_v54  ;;  %v2424_v54 = vld [vmem:[%s3648_s6 + $0x20] ss:$8 sps:$4 sm:$0xff]  }
  0xc7   : > { %v615_v53 = vadd.f32 1e-05, %v613_v49  ;;  %v2427_v49 = vld [vmem:[%s3648_s6 + $0x120] ss:$8 sps:$4 sm:$0xff]  }
  0xc9   : > { %2506 = vrsqrt.f32 %v615_v53  ;;  %v2432_v53 = vld [vmem:[%s3648_s6 + $0x14] ss:$8 sps:$4 sm:$0xff]  }
  0xd6   : > { %v2507_v60 = vpop.eup %2506 }
  0xd7   : > { %v617_v56 = vmul.f32 %v2507_v60, %v614_v59 }
  0xd9   : > { %v619_v28 = vmul.f32 %v617_v56, %v2986_v6  ;;  %v3111_v63 = vrot.slane %v617_v56, %v3102_v25 }
  0xdb   : > { %v620_v7 = vsub.f32 %v618_v61, %v619_v28  ;;  %v643_v1 = vmul.f32 %v3111_v63, %v621_v62  ;;  %v644_v2 = vmul.f32 %v3111_v63, %v622_v58  ;;  %v645_v6 = vmul.f32 %v3111_v63, %v623_v29  ;;  %v2430_v61 = vld [vmem:[%s3648_s6 + $0x10] ss:$8 sps:$4 sm:$0xff]   ;;  %v2438_v58 = vld [vmem:[%s3648_s6 + $0x4] ss:$8 sps:$4 sm:$0xff]  }
  0xdc   : > { %v646_v32 = vmul.f32 %v3111_v63, %v624_v13  ;;  %v647_v41 = vmul.f32 %v3111_v63, %v625_v23  ;;  %v648_v33 = vmul.f32 %v3111_v63, %v626_v21  ;;  %v649_v39 = vmul.f32 %v3111_v63, %v627_v11  ;;  %v2433_v62 = vld [vmem:[%s3648_s6 + $0x110] ss:$8 sps:$4 sm:$0xff]   ;;  %v2441_v28 = vld [vmem:[%s3648_s6 + $0x104] ss:$8 sps:$4 sm:$0xff]   ;;  %v2436_v13 = vld [vmem:[%s3648_s6] ss:$8 sps:$4 sm:$0xff]  }
  0xdd   : > { %v3118_v3 = vrot.slane %v620_v7, %v3102_v25  ;;  %v650_v50 = vmul.f32 %v3111_v63, %v628_v12  ;;  %v651_v60 = vmul.f32 %v3111_v63, %v629_v22  ;;  %v652_v56 = vmul.f32 %v3111_v63, %v630_v48  ;;  %v632_v29 = vld [vmem:[%s3099_s30 + $0x58] sm:$0xff]  ;;  %v633_v21 = vld [vmem:[%s3099_s30 + $0x60] sm:$0xff]  ;;  %v635_v12 = vld [vmem:[%s3099_s30 + $0x70] sm:$0xff] }
  0xde   : > { %v2477_v22 = vld [vmem:[%s3648_s6 + $0x1a4] ss:$8 sps:$4 sm:$0xff]   ;;  %v2480_v48 = vld [vmem:[%s3648_s6 + $0x94] ss:$8 sps:$4 sm:$0xff]  }
  0xdf   : > { %v665_v4 = vadd.f32 %v3118_v3, %v643_v1  ;;  %v666_v5 = vadd.f32 %v3118_v3, %v644_v2  ;;  %v667_v18 = vadd.f32 %v3118_v3, %v645_v6  ;;  %v668_v20 = vadd.f32 %v3118_v3, %v646_v32  ;;  %v631_v2 = vld [vmem:[%s3099_s30 + $0x50] sm:$0xff] }
  0xe0   : > { %v669_v44 = vadd.f32 %v3118_v3, %v647_v41  ;;  %v670_v34 = vadd.f32 %v3118_v3, %v648_v33  ;;  %v671_v52 = vadd.f32 %v3118_v3, %v649_v39  ;;  %v672_v45 = vadd.f32 %v3118_v3, %v650_v50  ;;  %v2447_v6 = vld [vmem:[%s3648_s6 + $0x1f4] ss:$8 sps:$4 sm:$0xff]  }
  0xe1   : > { %v681_v8 = vpack.c.bf16 %v666_v5, %v665_v4  ;;  %v682_v30 = vpack.c.bf16 %v668_v20, %v667_v18  ;;  %v673_v7 = vadd.f32 %v3118_v3, %v651_v60  ;;  %v674_v1 = vadd.f32 %v3118_v3, %v652_v56  ;;  %v2439_v4 = vld [vmem:[%s3648_s6 + $0x100] ss:$8 sps:$4 sm:$0xff]   ;;  %v2444_v5 = vld [vmem:[%s3648_s6 + $0xf4] ss:$8 sps:$4 sm:$0xff]   ;;  %v2453_v18 = vld [vmem:[%s3648_s6 + $0x1e4] ss:$8 sps:$4 sm:$0xff]  }
  0xe2   : > { %v683_v46 = vpack.c.bf16 %v670_v34, %v669_v44  ;;  %v684_v59 = vpack.c.bf16 %v672_v45, %v671_v52  ;;  %v655_v33 = vmul.f32 %v3111_v63, %v633_v21  ;;  %v2465_v44 = vld [vmem:[%s3648_s6 + $0x1c4] ss:$8 sps:$4 sm:$0xff]   ;;  %v657_v50 = vmul.f32 %v3111_v63, %v635_v12  ;;  %v2484_v60 = vld [vmem:[%s3648_s6 + $0x80] ss:$8 sps:$4 sm:$0xff]  }
  0xe3   : > { %2144 = vmatmul.mubr.msk.bf16.vlgmr.msra.gmra.mxu0 %vm409_vm0, %v681_v8  ;;  %2152 = vmatmul.mubr.msk.bf16.vlgmr.msra.gmra.mxu1 %vm409_vm0, %v681_v8  ;;  %v685_v32 = vpack.c.bf16 %v674_v1, %v673_v7  ;;  %v653_v8 = vmul.f32 %v3111_v63, %v631_v2  ;;  %v2474_v45 = vld [vmem:[%s3648_s6 + $0xa4] ss:$8 sps:$4 sm:$0xff]   ;;  %v2487_v56 = vld [vmem:[%s3648_s6 + $0x180] ss:$8 sps:$4 sm:$0xff]  }
  0xe4   : > { %825 = vmatprep.mubr.bf16.mxu0 %v2635_v0  ;;  %938 = vmatprep.mubr.bf16.mxu1 %v2635_v0  ;;  %v677_v34 = vadd.f32 %v3118_v3, %v655_v33  ;;  %v697_v7 = vld [vmem:[%s3647_s5] sm:$0xf] }
  0xe5   : > { %1502 = vmatpush1.bf16.msra.mxu0 %v2394_v14  ;;  %1615 = vmatpush1.bf16.msra.mxu1 %v2397_v16  ;;  %v654_v14 = vmul.f32 %v3111_v63, %v632_v29  ;;  %v2442_v16 = vld [vmem:[%s3648_s6 + $0xf0] ss:$8 sps:$4 sm:$0xff]   ;;  %v675_v20 = vadd.f32 %v3118_v3, %v653_v8 }
  0xe6   : > { %1503 = vmatprep.subr.bf16.mxu0 %v2402_v17  ;;  %1616 = vmatprep.subr.bf16.mxu1 %v2405_v35  ;;  %v2445_v17 = vld [vmem:[%s3648_s6 + $0x1f0] ss:$8 sps:$4 sm:$0xff]   ;;  %v2450_v35 = vld [vmem:[%s3648_s6 + $0xe4] ss:$8 sps:$4 sm:$0xff]  }
  0xe7   : > { %v676_v23 = vadd.f32 %v3118_v3, %v654_v14 }
  0xe9   : > { %1504 = vmatpush1.bf16.msra.mxu0 %v2400_v38  ;;  %1617 = vmatpush1.bf16.msra.mxu1 %v2403_v24  ;;  %v634_v38 = vld [vmem:[%s3099_s30 + $0x68] sm:$0xff]  ;;  %v686_v41 = vpack.c.bf16 %v676_v23, %v675_v20 }
  0xea   : > { %1505 = vmatprep.subr.bf16.mxu0 %v2408_v27  ;;  %1618 = vmatprep.subr.bf16.mxu1 %v2411_v26  ;;  %v2448_v24 = vld [vmem:[%s3648_s6 + $0xe0] ss:$8 sps:$4 sm:$0xff]   ;;  %v2456_v26 = vld [vmem:[%s3648_s6 + $0xd4] ss:$8 sps:$4 sm:$0xff]  }
  0xeb   : > { %2145 = vmatmul.mubr.msk.bf16.gmra.mxu0 %vm409_vm0, %v682_v30  ;;  %2153 = vmatmul.mubr.msk.bf16.gmra.mxu1 %vm409_vm0, %v682_v30  ;;  %v2451_v27 = vld [vmem:[%s3648_s6 + $0x1e0] ss:$8 sps:$4 sm:$0xff]   ;;  %v2459_v30 = vld [vmem:[%s3648_s6 + $0x1d4] ss:$8 sps:$4 sm:$0xff]  }
  0xec   : > { %835 = vmatprep.mubr.bf16.mxu0 %v2635_v0  ;;  %948 = vmatprep.mubr.bf16.mxu1 %v2635_v0 }
  0xed   : > { %1506 = vmatpush1.bf16.msra.mxu0 %v2406_v31  ;;  %1619 = vmatpush1.bf16.msra.mxu1 %v2409_v9  ;;  %v656_v31 = vmul.f32 %v3111_v63, %v634_v38  ;;  %v2454_v9 = vld [vmem:[%s3648_s6 + $0xd0] ss:$8 sps:$4 sm:$0xff]  }
  0xee   : > { %1507 = vmatprep.subr.bf16.mxu0 %v2414_v10  ;;  %1620 = vmatprep.subr.bf16.mxu1 %v2417_v37  ;;  %v2457_v10 = vld [vmem:[%s3648_s6 + $0x1d0] ss:$8 sps:$4 sm:$0xff]   ;;  %v2462_v37 = vld [vmem:[%s3648_s6 + $0xc4] ss:$8 sps:$4 sm:$0xff]  }
  0xef   : > { %v678_v11 = vadd.f32 %v3118_v3, %v656_v31 }
  0xf1   : > { %1508 = vmatpush1.bf16.msra.mxu0 %v2412_v42  ;;  %1621 = vmatpush1.bf16.msra.mxu1 %v2415_v47  ;;  %v636_v42 = vld [vmem:[%s3099_s30 + $0x78] sm:$0xff]  ;;  %v2460_v47 = vld [vmem:[%s3648_s6 + $0xc0] ss:$8 sps:$4 sm:$0xff]   ;;  %v687_v39 = vpack.c.bf16 %v678_v11, %v677_v34  ;;  %s366_s30 = sand.u32 1, %s2622_s14  }
  0xf2   : > { %1509 = vmatprep.subr.bf16.mxu0 %v2420_v36  ;;  %1622 = vmatprep.subr.bf16.mxu1 %v2423_v15  ;;  %v2463_v36 = vld [vmem:[%s3648_s6 + $0x1c0] ss:$8 sps:$4 sm:$0xff]   ;;  %v2468_v15 = vld [vmem:[%s3648_s6 + $0xb4] ss:$8 sps:$4 sm:$0xff]   ;;  %s2133_s28 = sshll.u32 %s366_s30, 7  ;;  %s3602_s25 = scalar_lea.sflag [#allocation4], %s366_s30 }
  0xf3   : > { %2146 = vmatmul.mubr.msk.bf16.gmra.mxu0 %vm409_vm0, %v683_v46  ;;  %2154 = vmatmul.mubr.msk.bf16.gmra.mxu1 %vm409_vm0, %v683_v46  ;;  %v2471_v46 = vld [vmem:[%s3648_s6 + $0x1b4] ss:$8 sps:$4 sm:$0xff]   ;;  %s3561_s29 = scalar_lea.vmem [#allocation5], %s2133_s28  ;;  %s2572_s28 = scalar_lea.vmem %s2571_s27, 4096 }
  0xf4   : > { %845 = vmatprep.mubr.bf16.mxu0 %v2635_v0  ;;  %958 = vmatprep.mubr.bf16.mxu1 %v2635_v0  ;;  %s2053_s12 = sshll.u32 %s3561_s29, 4  ;;  %s3597_s12 = int_to_ptr.vmem [resolvable:$true] %s2053_s12 }
  0xf5   : > { %1510 = vmatpush1.bf16.msra.mxu0 %v2418_v40  ;;  %1623 = vmatpush1.bf16.msra.mxu1 %v2421_v43  ;;  %v658_v40 = vmul.f32 %v3111_v63, %v636_v42  ;;  %v2466_v43 = vld [vmem:[%s3648_s6 + $0xb0] ss:$8 sps:$4 sm:$0xff]   ;;  %s2566_s26 = scalar_lea.vmem %s3597_s12, 2048  ;;  %p2573_p11 = scmp.lt.s32.totalorder %s3597_s12, %s2571_s27 }
  0xf6   : > { %1511 = vmatprep.subr.bf16.mxu0 %v2426_v51  ;;  %1624 = vmatprep.subr.bf16.mxu1 %v2429_v19  ;;  %v2469_v51 = vld [vmem:[%s3648_s6 + $0x1b0] ss:$8 sps:$4 sm:$0xff]   ;;  %v679_v19 = vadd.f32 %v3118_v3, %v657_v50  ;;  %p2567_p8 = scmp.ne.s32.totalorder %s3597_s12, %s2566_s26  ;;  %p2574_p12 = scmp.lt.s32.totalorder %s2572_s28, %s2566_s26 }
  0xf7   : > { %v680_v63 = vadd.f32 %v3118_v3, %v658_v40  ;;  %v2472_v3 = vld [vmem:[%s3648_s6 + $0xa0] ss:$8 sps:$4 sm:$0xff]  }
  0xf8   : > { %p2568_p9 = pnand %p2567_p8, %p2732_p5  ;;  %p2575_p13 = por %p2574_p12, %p2573_p11 }
  0xf9   : > { %1512 = vmatpush1.bf16.msra.mxu0 %v2424_v54  ;;  %1625 = vmatpush1.bf16.msra.mxu1 %v2427_v49  ;;  %v688_v52 = vpack.c.bf16 %v680_v63, %v679_v19  ;;  %v2483_v54 = vld [vmem:[%s3648_s6 + $0x194] ss:$8 sps:$4 sm:$0xff]   ;;  %v2478_v49 = vld [vmem:[%s3648_s6 + $0x90] ss:$8 sps:$4 sm:$0xff]  }
  0xfa   : > { %1513 = vmatprep.subr.bf16.mxu0 %v2432_v53  ;;  %1626 = vmatprep.subr.bf16.mxu1 %v2435_v57  ;;  %v2481_v53 = vld [vmem:[%s3648_s6 + $0x190] ss:$8 sps:$4 sm:$0xff]   ;;  %v2486_v57 = vld [vmem:[%s3648_s6 + $0x84] ss:$8 sps:$4 sm:$0xff]   ;;  %p2569_p10 = pneg %p2568_p9 }
  0xfb   : > { %2147 = vmatmul.mubr.msk.bf16.gmra.mxu0 %vm409_vm0, %v684_v59  ;;  %2155 = vmatmul.mubr.msk.bf16.gmra.mxu1 %vm409_vm0, %v684_v59  ;;  %v2489_v59 = vld [vmem:[%s3648_s6 + $0x184] ss:$8 sps:$4 sm:$0xff]  }
  0xfc   : > { %855 = vmatprep.mubr.bf16.mxu0 %v2635_v0  ;;  %968 = vmatprep.mubr.bf16.mxu1 %v2635_v0  ;;  %p2576_p0 = pnand %p2575_p13, %p2569_p10 }
  0xfd   : > { %1514 = vmatpush1.bf16.msra.mxu0 %v2430_v61  ;;  %1627 = vmatpush1.bf16.msra.mxu1 %v2433_v62  ;;  %v2490_v61 = vld [vmem:[%s3650_s8 + $0x78] sm:$0xff]   ;;  %v705_v62 = vsub.s32 1, %v3091_v55 }
  0xfe   : > { %1515 = vmatprep.subr.bf16.mxu0 %v2438_v58  ;;  %1628 = vmatprep.subr.bf16.mxu1 %v2441_v28  ;;  %v713_v58 = vsub.s32 3, %v3091_v55  ;;  %v709_v28 = vsub.s32 2, %v3091_v55 }
  0xff   : > { %v3389_v29 = vrot.slane %v697_v7, %v705_v62 }
 0x101   : > { %1516 = vmatpush1.bf16.msra.mxu0 %v2436_v13  ;;  %1629 = vmatpush1.bf16.msra.mxu1 %v2439_v4  ;;  %v3391_v13 = vrot.slane %v697_v7, %v713_v58  ;;  %v3394_v4 = vrot.slane %v697_v7, %v3102_v25 }
 0x102   : > { %1517 = vmatprep.subr.bf16.mxu0 %v2444_v5  ;;  %1630 = vmatprep.subr.bf16.mxu1 %v2447_v6  ;;  %v3396_v5 = vrot.slane %v697_v7, %v709_v28 }
 0x103   : > { %2148 = vmatmul.mubr.msk.bf16.gmra.mxu0 %vm409_vm0, %v685_v32  ;;  %2156 = vmatmul.mubr.msk.bf16.gmra.mxu1 %vm409_vm0, %v685_v32 }
 0x104   : > { %865 = vmatprep.mubr.bf16.mxu0 %v2635_v0  ;;  %978 = vmatprep.mubr.bf16.mxu1 %v2635_v0 }
 0x105   : > { %1518 = vmatpush2.bf16.msra.mxu0 %v2442_v16  ;;  %1631 = vmatpush2.bf16.msra.mxu1 %v2445_v17 }
 0x106   : > { %1519 = vmatprep.subr.bf16.mxu0 %v2450_v35  ;;  %1632 = vmatprep.subr.bf16.mxu1 %v2453_v18 }
 0x109   : > { %1520 = vmatpush2.bf16.msra.mxu0 %v2448_v24  ;;  %1633 = vmatpush2.bf16.msra.mxu1 %v2451_v27 }
 0x10a   : > { %1521 = vmatprep.subr.bf16.mxu0 %v2456_v26  ;;  %1634 = vmatprep.subr.bf16.mxu1 %v2459_v30 }
 0x10b   : > { %2149 = vmatmul.mubr.msk.bf16.gmra.mxu0 %vm409_vm0, %v686_v41  ;;  %2157 = vmatmul.mubr.msk.bf16.gmra.mxu1 %vm409_vm0, %v686_v41 }
 0x10c   : > { %875 = vmatprep.mubr.bf16.mxu0 %v2635_v0  ;;  %988 = vmatprep.mubr.bf16.mxu1 %v2635_v0 }
 0x10d   : > { %1522 = vmatpush2.bf16.msra.mxu0 %v2454_v9  ;;  %1635 = vmatpush2.bf16.msra.mxu1 %v2457_v10 }
 0x10e   : > { %1523 = vmatprep.subr.bf16.mxu0 %v2462_v37  ;;  %1636 = vmatprep.subr.bf16.mxu1 %v2465_v44 }
 0x111   : > { %1524 = vmatpush2.bf16.msra.mxu0 %v2460_v47  ;;  %1637 = vmatpush2.bf16.msra.mxu1 %v2463_v36  ;;  %v2491_v36 = vld [vmem:[%s3650_s8 + $0x38] sm:$0xff]  }
 0x112   : > { %1525 = vmatprep.subr.bf16.mxu0 %v2468_v15  ;;  %1638 = vmatprep.subr.bf16.mxu1 %v2471_v46 }
 0x113   : > { %2150 = vmatmul.mubr.msk.bf16.gmra.mxu0 %vm409_vm0, %v687_v39  ;;  %2158 = vmatmul.mubr.msk.bf16.gmra.mxu1 %vm409_vm0, %v687_v39 }
 0x114   : > { %885 = vmatprep.mubr.bf16.mxu0 %v2635_v0  ;;  %998 = vmatprep.mubr.bf16.mxu1 %v2635_v0  ;;  %v2475_v0 = vld [vmem:[%s3648_s6 + $0x1a0] ss:$8 sps:$4 sm:$0xff]  }
 0x115   : > { %1526 = vmatpush2.bf16.msra.mxu0 %v2466_v43  ;;  %1639 = vmatpush2.bf16.msra.mxu1 %v2469_v51  ;;  %v2492_v43 = vld [vmem:[%s3650_s8 + $0x70] sm:$0xff]  }
 0x116   : > { %1527 = vmatprep.subr.bf16.mxu0 %v2474_v45  ;;  %1640 = vmatprep.subr.bf16.mxu1 %v2477_v22 }
 0x119   : > { %1528 = vmatpush2.bf16.msra.mxu0 %v2472_v3  ;;  %1641 = vmatpush2.bf16.msra.mxu1 %v2475_v0 }
 0x11a   : > { %1529 = vmatprep.subr.bf16.mxu0 %v2480_v48  ;;  %1642 = vmatprep.subr.bf16.mxu1 %v2483_v54  ;;  %v2493_v54 = vld [vmem:[%s3650_s8 + $0x30] sm:$0xff]  }
 0x11b   : > { %2151 = vmatmul.mubr.msk.bf16.gmra.mxu0 %vm409_vm0, %v688_v52  ;;  %2159 = vmatmul.mubr.msk.bf16.gmra.mxu1 %vm409_vm0, %v688_v52 }
 0x11d   : > { %1530 = vmatpush2.bf16.msra.mxu0 %v2478_v49  ;;  %1643 = vmatpush2.bf16.msra.mxu1 %v2481_v53 }
 0x11e   : > { %1531 = vmatprep.subr.bf16.mxu0 %v2486_v57  ;;  %1644 = vmatprep.subr.bf16.mxu1 %v2489_v59 }
 0x121   : > { %1532 = vmatpush2.bf16.msra.mxu0 %v2484_v60  ;;  %1645 = vmatpush2.bf16.msra.mxu1 %v2487_v56  ;;  %v2494_v60 = vld [vmem:[%s3650_s8 + $0x68] sm:$0xff]  }
 0x122   : > { %2247 = vmatprep.subr.bf16.mxu0 %v2490_v61  ;;  %2311 = vmatprep.subr.bf16.mxu1 %v2490_v61 }
 0x1a3   : > { %v817_v1 = vpop.f32.mrf.mxu0  ;;  %v930_v2 = vpop.f32.mrf.mxu1 }
 0x1a4   : > { %v818_v20 = vadd.f32 %v817_v1, %v3394_v4  ;;  %v931_v23 = vadd.f32 %v930_v2, %v3396_v5 }
 0x1a5   : > { %v819_v6 = vpop.f32.mrf.mxu0  ;;  %v932_v32 = vpop.f32.mrf.mxu1 }
 0x1a6   : > { %v820_v16 = vadd.f32 %v819_v6, %v3389_v29  ;;  %v933_v17 = vadd.f32 %v932_v32, %v3391_v13  ;;  %v1009_v44 = vmax.f32 %v818_v20, 0.0  ;;  %v1011_v34 = vmax.f32 %v931_v23, 0.0  ;;  %v2496_v23 = vld [vmem:[%s3650_s8 + $0x60] sm:$0xff]  }
 0x1a7   : > { %v821_v8 = vpop.f32.mrf.mxu0  ;;  %v934_v14 = vpop.f32.mrf.mxu1 }
 0x1a8   : > { %v822_v35 = vadd.f32 %v821_v8, %v3394_v4  ;;  %v935_v18 = vadd.f32 %v934_v14, %v3396_v5  ;;  %v1010_v31 = vmax.f32 %v820_v16, 0.0  ;;  %v1012_v9 = vmax.f32 %v933_v17, 0.0  ;;  %v2495_v14 = vld [vmem:[%s3650_s8 + $0x28] sm:$0xff]  }
 0x1a9   : > { %v823_v21 = vpop.f32.mrf.mxu0  ;;  %v936_v38 = vpop.f32.mrf.mxu1 }
 0x1aa   : > { %v824_v24 = vadd.f32 %v823_v21, %v3389_v29  ;;  %v937_v27 = vadd.f32 %v936_v38, %v3391_v13  ;;  %v1013_v26 = vmax.f32 %v822_v35, 0.0  ;;  %v1015_v30 = vmax.f32 %v935_v18, 0.0 }
 0x1ab   : > { %v827_v41 = vpop.f32.mrf.mxu0  ;;  %v940_v33 = vpop.f32.mrf.mxu1 }
 0x1ac   : > { %v1014_v10 = vmax.f32 %v824_v24, 0.0  ;;  %v1016_v37 = vmax.f32 %v937_v27, 0.0  ;;  %v1073_v15 = vpack.c.bf16 %v1013_v26, %v1009_v44  ;;  %v1075_v46 = vpack.c.bf16 %v1015_v30, %v1011_v34 }
 0x1ad   : > { %v829_v11 = vpop.f32.mrf.mxu0  ;;  %v942_v12 = vpop.f32.mrf.mxu1  ;;  %v828_v52 = vadd.f32 %v827_v41, %v3394_v4  ;;  %v941_v45 = vadd.f32 %v940_v33, %v3396_v5 }
 0x1ae   : > { %v1074_v42 = vpack.c.bf16 %v1014_v10, %v1010_v31  ;;  %v1076_v47 = vpack.c.bf16 %v1016_v37, %v1012_v9  ;;  %v830_v39 = vadd.f32 %v829_v11, %v3389_v29  ;;  %v943_v51 = vadd.f32 %v942_v12, %v3391_v13  ;;  %v2497_v9 = vld [vmem:[%s3650_s8 + $0x20] sm:$0xff]  }
 0x1af   : > { %v831_v50 = vpop.f32.mrf.mxu0  ;;  %v944_v40 = vpop.f32.mrf.mxu1  ;;  %v1017_v7 = vmax.f32 %v828_v52, 0.0  ;;  %v1019_v1 = vmax.f32 %v941_v45, 0.0 }
 0x1b0   : > { %v832_v19 = vadd.f32 %v831_v50, %v3394_v4  ;;  %v945_v63 = vadd.f32 %v944_v40, %v3396_v5  ;;  %1533 = vmatprep.mubr.bf16.mxu0 %v1074_v42  ;;  %1646 = vmatprep.mubr.bf16.mxu1 %v1076_v47  ;;  %v1018_v56 = vmax.f32 %v830_v39, 0.0  ;;  %v1020_v61 = vmax.f32 %v943_v51, 0.0 }
 0x1b1   : > { %v833_v22 = vpop.f32.mrf.mxu0  ;;  %v946_v3 = vpop.f32.mrf.mxu1  ;;  %1534 = vmatmul.mubr.bf16.vlgmr.msra.gmra.mxu0 %v1073_v15  ;;  %1647 = vmatmul.mubr.bf16.vlgmr.msra.gmra.mxu1 %v1075_v46 }
 0x1b2   : > { %v834_v0 = vadd.f32 %v833_v22, %v3389_v29  ;;  %v947_v48 = vadd.f32 %v946_v3, %v3391_v13  ;;  %2248 = vmatpush3.bf16.msra.mxu0 %v2491_v36  ;;  %2319 = vmatpush3.bf16.msra.mxu1 %v2491_v36  ;;  %v1021_v49 = vmax.f32 %v832_v19, 0.0  ;;  %v1023_v53 = vmax.f32 %v945_v63, 0.0 }
 0x1b3   : > { %v837_v57 = vpop.f32.mrf.mxu0  ;;  %v950_v59 = vpop.f32.mrf.mxu1  ;;  %2249 = vmatprep.subr.bf16.mxu0 %v2492_v43  ;;  %2312 = vmatprep.subr.bf16.mxu1 %v2492_v43 }
 0x1b4   : > { %v1022_v58 = vmax.f32 %v834_v0, 0.0  ;;  %v1024_v28 = vmax.f32 %v947_v48, 0.0  ;;  %v1077_v16 = vpack.c.bf16 %v1021_v49, %v1017_v7  ;;  %v1079_v17 = vpack.c.bf16 %v1023_v53, %v1019_v1 }
 0x1b5   : > { %v839_v2 = vpop.f32.mrf.mxu0  ;;  %v952_v6 = vpop.f32.mrf.mxu1  ;;  %v838_v27 = vadd.f32 %v837_v57, %v3394_v4  ;;  %v951_v26 = vadd.f32 %v950_v59, %v3396_v5 }
 0x1b6   : > { %v1078_v32 = vpack.c.bf16 %v1022_v58, %v1018_v56  ;;  %v1080_v8 = vpack.c.bf16 %v1024_v28, %v1020_v61  ;;  %2250 = vmatpush3.bf16.msra.mxu0 %v2493_v54  ;;  %v840_v35 = vadd.f32 %v839_v2, %v3389_v29  ;;  %2320 = vmatpush3.bf16.msra.mxu1 %v2493_v54 }
 0x1b7   : > { %v841_v18 = vpop.f32.mrf.mxu0  ;;  %v954_v20 = vpop.f32.mrf.mxu1  ;;  %2251 = vmatprep.subr.bf16.mxu0 %v2494_v60  ;;  %v953_v21 = vadd.f32 %v952_v6, %v3391_v13  ;;  %2313 = vmatprep.subr.bf16.mxu1 %v2494_v60  ;;  %v1025_v36 = vmax.f32 %v838_v27, 0.0  ;;  %v1027_v15 = vmax.f32 %v951_v26, 0.0 }
 0x1b8   : > { %v842_v38 = vadd.f32 %v841_v18, %v3394_v4  ;;  %v955_v24 = vadd.f32 %v954_v20, %v3396_v5  ;;  %1543 = vmatprep.mubr.bf16.mxu0 %v1078_v32  ;;  %1656 = vmatprep.mubr.bf16.mxu1 %v1080_v8  ;;  %v1026_v11 = vmax.f32 %v840_v35, 0.0 }
 0x1b9   : > { %v843_v30 = vpop.f32.mrf.mxu0  ;;  %v956_v41 = vpop.f32.mrf.mxu1  ;;  %1544 = vmatmul.mubr.bf16.gmra.mxu0 %v1077_v16  ;;  %1657 = vmatmul.mubr.bf16.gmra.mxu1 %v1079_v17  ;;  %v1028_v12 = vmax.f32 %v953_v21, 0.0 }
 0x1ba   : > { %v844_v33 = vadd.f32 %v843_v30, %v3389_v29  ;;  %v957_v31 = vadd.f32 %v956_v41, %v3391_v13  ;;  %2252 = vmatpush3.bf16.msra.mxu0 %v2495_v14  ;;  %v1029_v10 = vmax.f32 %v842_v38, 0.0  ;;  %v1031_v37 = vmax.f32 %v955_v24, 0.0  ;;  %2321 = vmatpush3.bf16.msra.mxu1 %v2495_v14 }
 0x1bb   : > { %v847_v44 = vpop.f32.mrf.mxu0  ;;  %v960_v34 = vpop.f32.mrf.mxu1  ;;  %2253 = vmatprep.subr.bf16.mxu0 %v2496_v23  ;;  %2314 = vmatprep.subr.bf16.mxu1 %v2496_v23 }
 0x1bc   : > { %v1030_v42 = vmax.f32 %v844_v33, 0.0  ;;  %v1032_v47 = vmax.f32 %v957_v31, 0.0  ;;  %v1081_v43 = vpack.c.bf16 %v1029_v10, %v1025_v36  ;;  %v1083_v51 = vpack.c.bf16 %v1031_v37, %v1027_v15 }
 0x1bd   : > { %v849_v46 = vpop.f32.mrf.mxu0  ;;  %v962_v39 = vpop.f32.mrf.mxu1  ;;  %v848_v0 = vadd.f32 %v847_v44, %v3394_v4  ;;  %v961_v48 = vadd.f32 %v960_v34, %v3396_v5 }
 0x1be   : > { %v1082_v50 = vpack.c.bf16 %v1030_v42, %v1026_v11  ;;  %v1084_v40 = vpack.c.bf16 %v1032_v47, %v1028_v12  ;;  %2254 = vmatpush3.bf16.msra.mxu0 %v2497_v9  ;;  %v850_v19 = vadd.f32 %v849_v46, %v3389_v29  ;;  %2322 = vmatpush3.bf16.msra.mxu1 %v2497_v9 }
 0x1bf   : > { %v851_v63 = vpop.f32.mrf.mxu0  ;;  %v964_v52 = vpop.f32.mrf.mxu1  ;;  %v963_v45 = vadd.f32 %v962_v39, %v3391_v13  ;;  %v1033_v2 = vmax.f32 %v848_v0, 0.0  ;;  %v1035_v6 = vmax.f32 %v961_v48, 0.0 }
 0x1c0   : > { %v852_v22 = vadd.f32 %v851_v63, %v3394_v4  ;;  %v965_v3 = vadd.f32 %v964_v52, %v3396_v5  ;;  %1553 = vmatprep.mubr.bf16.mxu0 %v1082_v50  ;;  %1666 = vmatprep.mubr.bf16.mxu1 %v1084_v40  ;;  %v1034_v58 = vmax.f32 %v850_v19, 0.0 }
 0x1c1   : > { %v853_v54 = vpop.f32.mrf.mxu0  ;;  %v966_v49 = vpop.f32.mrf.mxu1  ;;  %1554 = vmatmul.mubr.bf16.gmra.mxu0 %v1081_v43  ;;  %1667 = vmatmul.mubr.bf16.gmra.mxu1 %v1083_v51  ;;  %v1036_v28 = vmax.f32 %v963_v45, 0.0 }
 0x1c2   : > { %v854_v53 = vadd.f32 %v853_v54, %v3389_v29  ;;  %v967_v57 = vadd.f32 %v966_v49, %v3391_v13  ;;  %v1037_v59 = vmax.f32 %v852_v22, 0.0  ;;  %v1039_v60 = vmax.f32 %v965_v3, 0.0 }
 0x1c3   : > { %v857_v56 = vpop.f32.mrf.mxu0  ;;  %v970_v61 = vpop.f32.mrf.mxu1 }
 0x1c4   : > { %v1038_v7 = vmax.f32 %v854_v53, 0.0  ;;  %v1040_v1 = vmax.f32 %v967_v57, 0.0  ;;  %v1085_v17 = vpack.c.bf16 %v1037_v59, %v1033_v2  ;;  %v1087_v35 = vpack.c.bf16 %v1039_v60, %v1035_v6 }
 0x1c5   : > { %v859_v32 = vpop.f32.mrf.mxu0  ;;  %v972_v8 = vpop.f32.mrf.mxu1  ;;  %v858_v27 = vadd.f32 %v857_v56, %v3394_v4  ;;  %v971_v26 = vadd.f32 %v970_v61, %v3396_v5 }
 0x1c6   : > { %v1086_v14 = vpack.c.bf16 %v1038_v7, %v1034_v58  ;;  %v1088_v16 = vpack.c.bf16 %v1040_v1, %v1036_v28  ;;  %v860_v18 = vadd.f32 %v859_v32, %v3389_v29  ;;  %v973_v21 = vadd.f32 %v972_v8, %v3391_v13 }
 0x1c7   : > { %v861_v20 = vpop.f32.mrf.mxu0  ;;  %v974_v23 = vpop.f32.mrf.mxu1  ;;  %v1041_v47 = vmax.f32 %v858_v27, 0.0  ;;  %v1043_v36 = vmax.f32 %v971_v26, 0.0 }
 0x1c8   : > { %v862_v38 = vadd.f32 %v861_v20, %v3394_v4  ;;  %v975_v24 = vadd.f32 %v974_v23, %v3396_v5  ;;  %1563 = vmatprep.mubr.bf16.mxu0 %v1086_v14  ;;  %1676 = vmatprep.mubr.bf16.mxu1 %v1088_v16  ;;  %v1042_v34 = vmax.f32 %v860_v18, 0.0  ;;  %v1044_v11 = vmax.f32 %v973_v21, 0.0 }
 0x1c9   : > { %v863_v30 = vpop.f32.mrf.mxu0  ;;  %v976_v41 = vpop.f32.mrf.mxu1  ;;  %1564 = vmatmul.mubr.bf16.gmra.mxu0 %v1085_v17  ;;  %1677 = vmatmul.mubr.bf16.gmra.mxu1 %v1087_v35 }
 0x1ca   : > { %v864_v33 = vadd.f32 %v863_v30, %v3389_v29  ;;  %v977_v31 = vadd.f32 %v976_v41, %v3391_v13  ;;  %v1045_v9 = vmax.f32 %v862_v38, 0.0  ;;  %v1047_v10 = vmax.f32 %v975_v24, 0.0 }
 0x1cb   : > { %v867_v37 = vpop.f32.mrf.mxu0  ;;  %v980_v44 = vpop.f32.mrf.mxu1 }
 0x1cc   : > { %v1046_v12 = vmax.f32 %v864_v33, 0.0  ;;  %v1048_v42 = vmax.f32 %v977_v31, 0.0  ;;  %v1089_v40 = vpack.c.bf16 %v1045_v9, %v1041_v47  ;;  %v1091_v43 = vpack.c.bf16 %v1047_v10, %v1043_v36 }
 0x1cd   : > { %v869_v15 = vpop.f32.mrf.mxu0  ;;  %v982_v46 = vpop.f32.mrf.mxu1  ;;  %v868_v3 = vadd.f32 %v867_v37, %v3394_v4  ;;  %v981_v0 = vadd.f32 %v980_v44, %v3396_v5 }
 0x1ce   : > { %v1090_v39 = vpack.c.bf16 %v1046_v12, %v1042_v34  ;;  %v1092_v50 = vpack.c.bf16 %v1048_v42, %v1044_v11  ;;  %v870_v51 = vadd.f32 %v869_v15, %v3389_v29  ;;  %v983_v52 = vadd.f32 %v982_v46, %v3391_v13 }
 0x1cf   : > { %v871_v19 = vpop.f32.mrf.mxu0  ;;  %v984_v63 = vpop.f32.mrf.mxu1  ;;  %v1049_v1 = vmax.f32 %v868_v3, 0.0  ;;  %v1051_v2 = vmax.f32 %v981_v0, 0.0 }
 0x1d0   : > { %v872_v45 = vadd.f32 %v871_v19, %v3394_v4  ;;  %v985_v22 = vadd.f32 %v984_v63, %v3396_v5  ;;  %1573 = vmatprep.mubr.bf16.mxu0 %v1090_v39  ;;  %1686 = vmatprep.mubr.bf16.mxu1 %v1092_v50  ;;  %v1050_v61 = vmax.f32 %v870_v51, 0.0  ;;  %v1052_v58 = vmax.f32 %v983_v52, 0.0 }
 0x1d1   : > { %v873_v48 = vpop.f32.mrf.mxu0  ;;  %v986_v54 = vpop.f32.mrf.mxu1  ;;  %1574 = vmatmul.mubr.bf16.gmra.mxu0 %v1089_v40  ;;  %1687 = vmatmul.mubr.bf16.gmra.mxu1 %v1091_v43 }
 0x1d2   : > { %v874_v49 = vadd.f32 %v873_v48, %v3389_v29  ;;  %v987_v53 = vadd.f32 %v986_v54, %v3391_v13  ;;  %v1053_v57 = vmax.f32 %v872_v45, 0.0  ;;  %v1055_v59 = vmax.f32 %v985_v22, 0.0 }
 0x1d3   : > { %v877_v60 = vpop.f32.mrf.mxu0  ;;  %v990_v56 = vpop.f32.mrf.mxu1 }
 0x1d4   : > { %v1054_v28 = vmax.f32 %v874_v49, 0.0  ;;  %v1056_v7 = vmax.f32 %v987_v53, 0.0  ;;  %v1093_v16 = vpack.c.bf16 %v1053_v57, %v1049_v1  ;;  %v1095_v17 = vpack.c.bf16 %v1055_v59, %v1051_v2  ;;  %v2500_v2 = vld [vmem:[%s3650_s8 + $0x50] sm:$0xff]  }
 0x1d5   : > { %v879_v6 = vpop.f32.mrf.mxu0  ;;  %v992_v32 = vpop.f32.mrf.mxu1  ;;  %v878_v24 = vadd.f32 %v877_v60, %v3394_v4  ;;  %v991_v27 = vadd.f32 %v990_v56, %v3396_v5 }
 0x1d6   : > { %v1094_v8 = vpack.c.bf16 %v1054_v28, %v1050_v61  ;;  %v1096_v14 = vpack.c.bf16 %v1056_v7, %v1052_v58  ;;  %v880_v35 = vadd.f32 %v879_v6, %v3389_v29  ;;  %v993_v23 = vadd.f32 %v992_v32, %v3391_v13  ;;  %v2501_v6 = vld [vmem:[%s3650_s8 + $0x10] sm:$0xff]   ;;  %v2502_v32 = vld [vmem:[%s3650_s8 + $0x48] sm:$0xff]  }
 0x1d7   : > { %v881_v18 = vpop.f32.mrf.mxu0  ;;  %v994_v20 = vpop.f32.mrf.mxu1  ;;  %v1057_v42 = vmax.f32 %v878_v24, 0.0  ;;  %v1059_v47 = vmax.f32 %v991_v27, 0.0 }
 0x1d8   : > { %v882_v21 = vadd.f32 %v881_v18, %v3394_v4  ;;  %v995_v38 = vadd.f32 %v994_v20, %v3396_v5  ;;  %1583 = vmatprep.mubr.bf16.mxu0 %v1094_v8  ;;  %1696 = vmatprep.mubr.bf16.mxu1 %v1096_v14  ;;  %v1058_v44 = vmax.f32 %v880_v35, 0.0  ;;  %v1060_v34 = vmax.f32 %v993_v23, 0.0  ;;  %v2503_v8 = vld [vmem:[%s3650_s8 + $0x8] sm:$0xff]   ;;  %v2504_v14 = vld [vmem:[%s3650_s8 + $0x40] sm:$0xff]  }
 0x1d9   : > { %v883_v26 = vpop.f32.mrf.mxu0  ;;  %v996_v30 = vpop.f32.mrf.mxu1  ;;  %1584 = vmatmul.mubr.bf16.gmra.mxu0 %v1093_v16  ;;  %1697 = vmatmul.mubr.bf16.gmra.mxu1 %v1095_v17  ;;  %v2505_v16 = vld [vmem:[%s3650_s8] sm:$0xff]  }
 0x1da   : > { %v884_v41 = vadd.f32 %v883_v26, %v3389_v29  ;;  %v997_v33 = vadd.f32 %v996_v30, %v3391_v13  ;;  %v1061_v31 = vmax.f32 %v882_v21, 0.0  ;;  %v1063_v9 = vmax.f32 %v995_v38, 0.0  ;;  %v1169_v17 = vld [vmem:[%s3649_s7] sm:$0x3] }
 0x1db   : > { %v887_v10 = vpop.f32.mrf.mxu0  ;;  %v1000_v37 = vpop.f32.mrf.mxu1  ;;  %v3512_v35 = vrot.slane %v1169_v17, %v705_v62  ;;  %v3515_v18 = vrot.slane %v1169_v17, %v3102_v25 }
 0x1dc   : > { %v1062_v11 = vmax.f32 %v884_v41, 0.0  ;;  %v1064_v12 = vmax.f32 %v997_v33, 0.0  ;;  %v1097_v50 = vpack.c.bf16 %v1061_v31, %v1057_v42  ;;  %v1099_v40 = vpack.c.bf16 %v1063_v9, %v1059_v47 }
 0x1dd   : > { %v889_v36 = vpop.f32.mrf.mxu0  ;;  %v1002_v15 = vpop.f32.mrf.mxu1  ;;  %v888_v22 = vadd.f32 %v887_v10, %v3394_v4  ;;  %v1001_v3 = vadd.f32 %v1000_v37, %v3396_v5 }
 0x1de   : > { %v1098_v46 = vpack.c.bf16 %v1062_v11, %v1058_v44  ;;  %v1100_v39 = vpack.c.bf16 %v1064_v12, %v1060_v34  ;;  %v890_v43 = vadd.f32 %v889_v36, %v3389_v29  ;;  %v1003_v63 = vadd.f32 %v1002_v15, %v3391_v13 }
 0x1df   : > { %v891_v51 = vpop.f32.mrf.mxu0  ;;  %v1004_v19 = vpop.f32.mrf.mxu1  ;;  %v1065_v58 = vmax.f32 %v888_v22, 0.0  ;;  %v1067_v28 = vmax.f32 %v1001_v3, 0.0 }
 0x1e0   : > { %v892_v52 = vadd.f32 %v891_v51, %v3394_v4  ;;  %v1005_v45 = vadd.f32 %v1004_v19, %v3396_v5  ;;  %1593 = vmatprep.mubr.bf16.mxu0 %v1098_v46  ;;  %1706 = vmatprep.mubr.bf16.mxu1 %v1100_v39  ;;  %v1066_v59 = vmax.f32 %v890_v43, 0.0  ;;  %v1068_v60 = vmax.f32 %v1003_v63, 0.0 }
 0x1e1   : > { %v893_v0 = vpop.f32.mrf.mxu0  ;;  %v1006_v48 = vpop.f32.mrf.mxu1  ;;  %1594 = vmatmul.mubr.bf16.gmra.mxu0 %v1097_v50  ;;  %1707 = vmatmul.mubr.bf16.gmra.mxu1 %v1099_v40 }
 0x1e2   : > { %v894_v54 = vadd.f32 %v893_v0, %v3389_v29  ;;  %v1007_v49 = vadd.f32 %v1006_v48, %v3391_v13  ;;  %v1069_v53 = vmax.f32 %v892_v52, 0.0  ;;  %v1071_v57 = vmax.f32 %v1005_v45, 0.0  ;;  %v2498_v29 = vld [vmem:[%s3650_s8 + $0x58] sm:$0xff]  }
 0x1e3   : > { %v2499_v13 = vld [vmem:[%s3650_s8 + $0x18] sm:$0xff]   ;;  %2255 = vmatprep.subr.bf16.mxu0 %v2498_v29  ;;  %2315 = vmatprep.subr.bf16.mxu1 %v2498_v29 }
 0x1e4   : > { %v1070_v56 = vmax.f32 %v894_v54, 0.0  ;;  %v1072_v61 = vmax.f32 %v1007_v49, 0.0  ;;  %v1101_v1 = vpack.c.bf16 %v1069_v53, %v1065_v58  ;;  %v1103_v5 = vpack.c.bf16 %v1071_v57, %v1067_v28  ;;  %2256 = vmatpush3.bf16.msra.mxu0 %v2499_v13  ;;  %2323 = vmatpush3.bf16.msra.mxu1 %v2499_v13 }
 0x1e5   : > { %2257 = vmatprep.subr.bf16.mxu0 %v2500_v2  ;;  %2316 = vmatprep.subr.bf16.mxu1 %v2500_v2 }
 0x1e6   : > { %v1102_v7 = vpack.c.bf16 %v1070_v56, %v1066_v59  ;;  %v1104_v4 = vpack.c.bf16 %v1072_v61, %v1068_v60 }
 0x1e8   : > { %1603 = vmatprep.mubr.bf16.mxu0 %v1102_v7  ;;  %1716 = vmatprep.mubr.bf16.mxu1 %v1104_v4 }
 0x1e9   : > { %1604 = vmatmul.mubr.bf16.gmra.mxu0 %v1101_v1  ;;  %1717 = vmatmul.mubr.bf16.gmra.mxu1 %v1103_v5 }
 0x1ea   : > { %2258 = vmatpush3.bf16.msra.mxu0 %v2501_v6  ;;  %2324 = vmatpush3.bf16.msra.mxu1 %v2501_v6 }
 0x1eb   : > { %2259 = vmatprep.subr.bf16.mxu0 %v2502_v32  ;;  %2317 = vmatprep.subr.bf16.mxu1 %v2502_v32 }
 0x1ee   : > { %2260 = vmatpush3.bf16.msra.mxu0 %v2503_v8  ;;  %2325 = vmatpush3.bf16.msra.mxu1 %v2503_v8 }
 0x1ef   : > { %2261 = vmatprep.subr.bf16.mxu0 %v2504_v14  ;;  %2318 = vmatprep.subr.bf16.mxu1 %v2504_v14 }
 0x1f2   : > { %2262 = vmatpush3.bf16.msra.mxu0 %v2505_v16  ;;  %2326 = vmatpush3.bf16.msra.mxu1 %v2505_v16 }
 0x271   : > { %v1535_v20 = vpop.f32.mrf.mxu0  ;;  %v1648_v23 = vpop.f32.mrf.mxu1 }
 0x272   : > { %v1536_v27 = vadd.f32 %v1535_v20, %v3515_v18 }
 0x273   : > { %v1537_v21 = vpop.f32.mrf.mxu0  ;;  %v1650_v38 = vpop.f32.mrf.mxu1 }
 0x274   : > { %v1538_v24 = vadd.f32 %v1537_v21, %v3512_v35  ;;  %v1649_v25 = vadd.f32 %v1648_v23, %v1536_v27 }
 0x275   : > { %v1539_v26 = vpop.f32.mrf.mxu0  ;;  %v1652_v30 = vpop.f32.mrf.mxu1 }
 0x276   : > { %v1540_v41 = vadd.f32 %v1539_v26, %v3515_v18  ;;  %v1651_v55 = vadd.f32 %v1650_v38, %v1538_v24  ;;  %v1727_v15 = vmax.f32 %v1649_v25, 0.0 }
 0x277   : > { %v1541_v33 = vpop.f32.mrf.mxu0  ;;  %v1654_v31 = vpop.f32.mrf.mxu1 }
 0x278   : > { %v1653_v62 = vadd.f32 %v1652_v30, %v1540_v41  ;;  %v1542_v9 = vadd.f32 %v1541_v33, %v3512_v35  ;;  %v1728_v42 = vmax.f32 %v1651_v55, 0.0 }
 0x279   : > { %v1545_v10 = vpop.f32.mrf.mxu0  ;;  %v1658_v37 = vpop.f32.mrf.mxu1 }
 0x27a   : > { %v1655_v44 = vadd.f32 %v1654_v31, %v1542_v9  ;;  %v1729_v34 = vmax.f32 %v1653_v62, 0.0  ;;  %v1546_v46 = vadd.f32 %v1545_v10, %v3515_v18 }
 0x27b   : > { %v1547_v11 = vpop.f32.mrf.mxu0  ;;  %v1660_v12 = vpop.f32.mrf.mxu1 }
 0x27c   : > { %v1730_v47 = vmax.f32 %v1655_v44, 0.0  ;;  %v1548_v36 = vadd.f32 %v1547_v11, %v3512_v35  ;;  %v1759_v51 = vpack.c.bf16 %v1729_v34, %v1727_v15  ;;  %v1659_v3 = vadd.f32 %v1658_v37, %v1546_v46 }
 0x27d   : > { %v1549_v39 = vpop.f32.mrf.mxu0  ;;  %v1662_v50 = vpop.f32.mrf.mxu1 }
 0x27e   : > { %v1760_v40 = vpack.c.bf16 %v1730_v47, %v1728_v42  ;;  %v1550_v43 = vadd.f32 %v1549_v39, %v3515_v18  ;;  %v1661_v52 = vadd.f32 %v1660_v12, %v1548_v36  ;;  %v1731_v61 = vmax.f32 %v1659_v3, 0.0 }
 0x27f   : > { %v1551_v19 = vpop.f32.mrf.mxu0  ;;  %v1664_v63 = vpop.f32.mrf.mxu1 }
 0x280   : > { %v1663_v45 = vadd.f32 %v1662_v50, %v1550_v43  ;;  %v1552_v22 = vadd.f32 %v1551_v19, %v3512_v35  ;;  %1942 = vmatprep.mubr.bf16.mxu0 %v1760_v40  ;;  %v1732_v59 = vmax.f32 %v1661_v52, 0.0 }
 0x281   : > { %v1555_v0 = vpop.f32.mrf.mxu0  ;;  %v1668_v48 = vpop.f32.mrf.mxu1  ;;  %1943 = vmatmul.mubr.bf16.vlgmr.msra.gmra.mxu0 %v1759_v51 }
 0x282   : > { %v1665_v54 = vadd.f32 %v1664_v63, %v1552_v22  ;;  %v1733_v49 = vmax.f32 %v1663_v45, 0.0  ;;  %v1556_v58 = vadd.f32 %v1555_v0, %v3515_v18 }
 0x283   : > { %v1557_v53 = vpop.f32.mrf.mxu0  ;;  %v1670_v57 = vpop.f32.mrf.mxu1 }
 0x284   : > { %v1734_v60 = vmax.f32 %v1665_v54, 0.0  ;;  %v1558_v56 = vadd.f32 %v1557_v53, %v3512_v35  ;;  %v1761_v5 = vpack.c.bf16 %v1733_v49, %v1731_v61  ;;  %v1669_v8 = vadd.f32 %v1668_v48, %v1556_v58 }
 0x285   : > { %v1559_v28 = vpop.f32.mrf.mxu0  ;;  %v1672_v7 = vpop.f32.mrf.mxu1 }
 0x286   : > { %v1762_v4 = vpack.c.bf16 %v1734_v60, %v1732_v59  ;;  %v1560_v1 = vadd.f32 %v1559_v28, %v3515_v18  ;;  %v1671_v2 = vadd.f32 %v1670_v57, %v1558_v56  ;;  %v1735_v26 = vmax.f32 %v1669_v8, 0.0 }
 0x287   : > { %v1561_v29 = vpop.f32.mrf.mxu0  ;;  %v1674_v13 = vpop.f32.mrf.mxu1 }
 0x288   : > { %v1673_v6 = vadd.f32 %v1672_v7, %v1560_v1  ;;  %v1562_v32 = vadd.f32 %v1561_v29, %v3512_v35  ;;  %1950 = vmatprep.mubr.bf16.mxu0 %v1762_v4  ;;  %v1736_v38 = vmax.f32 %v1671_v2, 0.0 }
 0x289   : > { %v1565_v14 = vpop.f32.mrf.mxu0  ;;  %v1678_v16 = vpop.f32.mrf.mxu1  ;;  %1951 = vmatmul.mubr.bf16.gmra.mxu0 %v1761_v5 }
 0x28a   : > { %v1675_v17 = vadd.f32 %v1674_v13, %v1562_v32  ;;  %v1737_v20 = vmax.f32 %v1673_v6, 0.0  ;;  %v1566_v30 = vadd.f32 %v1565_v14, %v3515_v18 }
 0x28b   : > { %v1567_v23 = vpop.f32.mrf.mxu0  ;;  %v1680_v21 = vpop.f32.mrf.mxu1 }
 0x28c   : > { %v1738_v24 = vmax.f32 %v1675_v17, 0.0  ;;  %v1568_v27 = vadd.f32 %v1567_v23, %v3512_v35  ;;  %v1763_v62 = vpack.c.bf16 %v1737_v20, %v1735_v26  ;;  %v1679_v34 = vadd.f32 %v1678_v16, %v1566_v30 }
 0x28d   : > { %v1569_v41 = vpop.f32.mrf.mxu0  ;;  %v1682_v33 = vpop.f32.mrf.mxu1 }
 0x28e   : > { %v1764_v31 = vpack.c.bf16 %v1738_v24, %v1736_v38  ;;  %v1570_v55 = vadd.f32 %v1569_v41, %v3515_v18  ;;  %v1681_v10 = vadd.f32 %v1680_v21, %v1568_v27  ;;  %v1739_v40 = vmax.f32 %v1679_v34, 0.0 }
 0x28f   : > { %v1571_v9 = vpop.f32.mrf.mxu0  ;;  %v1684_v25 = vpop.f32.mrf.mxu1 }
 0x290   : > { %v1683_v37 = vadd.f32 %v1682_v33, %v1570_v55  ;;  %v1572_v44 = vadd.f32 %v1571_v9, %v3512_v35  ;;  %1958 = vmatprep.mubr.bf16.mxu0 %v1764_v31  ;;  %v1740_v46 = vmax.f32 %v1681_v10, 0.0 }
 0x291   : > { %v1575_v11 = vpop.f32.mrf.mxu0  ;;  %v1688_v12 = vpop.f32.mrf.mxu1  ;;  %1959 = vmatmul.mubr.bf16.gmra.mxu0 %v1763_v62 }
 0x292   : > { %v1685_v42 = vadd.f32 %v1684_v25, %v1572_v44  ;;  %v1741_v47 = vmax.f32 %v1683_v37, 0.0  ;;  %v1576_v43 = vadd.f32 %v1575_v11, %v3515_v18 }
 0x293   : > { %v1577_v36 = vpop.f32.mrf.mxu0  ;;  %v1690_v15 = vpop.f32.mrf.mxu1 }
 0x294   : > { %v1742_v39 = vmax.f32 %v1685_v42, 0.0  ;;  %v1578_v50 = vadd.f32 %v1577_v36, %v3512_v35  ;;  %v1765_v45 = vpack.c.bf16 %v1741_v47, %v1739_v40  ;;  %v1689_v49 = vadd.f32 %v1688_v12, %v1576_v43 }
 0x295   : > { %v1579_v51 = vpop.f32.mrf.mxu0  ;;  %v1692_v19 = vpop.f32.mrf.mxu1 }
 0x296   : > { %v1766_v63 = vpack.c.bf16 %v1742_v39, %v1740_v46  ;;  %v1580_v52 = vadd.f32 %v1579_v51, %v3515_v18  ;;  %v1691_v0 = vadd.f32 %v1690_v15, %v1578_v50  ;;  %v1743_v4 = vmax.f32 %v1689_v49, 0.0 }
 0x297   : > { %v1581_v22 = vpop.f32.mrf.mxu0  ;;  %v1694_v3 = vpop.f32.mrf.mxu1 }
 0x298   : > { %v1693_v48 = vadd.f32 %v1692_v19, %v1580_v52  ;;  %v1582_v54 = vadd.f32 %v1581_v22, %v3512_v35  ;;  %1966 = vmatprep.mubr.bf16.mxu0 %v1766_v63  ;;  %v1744_v58 = vmax.f32 %v1691_v0, 0.0 }
 0x299   : > { %v1585_v53 = vpop.f32.mrf.mxu0  ;;  %v1698_v57 = vpop.f32.mrf.mxu1  ;;  %1967 = vmatmul.mubr.bf16.gmra.mxu0 %v1765_v45 }
 0x29a   : > { %v1695_v59 = vadd.f32 %v1694_v3, %v1582_v54  ;;  %v1745_v60 = vmax.f32 %v1693_v48, 0.0  ;;  %v1586_v1 = vadd.f32 %v1585_v53, %v3515_v18 }
 0x29b   : > { %v1587_v56 = vpop.f32.mrf.mxu0  ;;  %v1700_v61 = vpop.f32.mrf.mxu1 }
 0x29c   : > { %v1746_v28 = vmax.f32 %v1695_v59, 0.0  ;;  %v1588_v7 = vadd.f32 %v1587_v56, %v3512_v35  ;;  %v1767_v6 = vpack.c.bf16 %v1745_v60, %v1743_v4  ;;  %v1699_v20 = vadd.f32 %v1698_v57, %v1586_v1 }
 0x29d   : > { %v1589_v5 = vpop.f32.mrf.mxu0  ;;  %v1702_v29 = vpop.f32.mrf.mxu1 }
 0x29e   : > { %v1768_v13 = vpack.c.bf16 %v1746_v28, %v1744_v58  ;;  %v1590_v2 = vadd.f32 %v1589_v5, %v3515_v18  ;;  %v1701_v14 = vadd.f32 %v1700_v61, %v1588_v7  ;;  %v1747_v31 = vmax.f32 %v1699_v20, 0.0  ;;  %v3552_v5 = vld [vmem:[%s3651_s9] ss:$0 sm:$0xff] }
 0x29f   : > { %v1591_v32 = vpop.f32.mrf.mxu0  ;;  %v1704_v8 = vpop.f32.mrf.mxu1 }
 0x2a0   : > { %v1703_v16 = vadd.f32 %v1702_v29, %v1590_v2  ;;  %v1592_v17 = vadd.f32 %v1591_v32, %v3512_v35  ;;  %1974 = vmatprep.mubr.bf16.mxu1 %v1768_v13  ;;  %v1748_v30 = vmax.f32 %v1701_v14, 0.0 }
 0x2a1   : > { %v1595_v23 = vpop.f32.mrf.mxu0  ;;  %v1708_v21 = vpop.f32.mrf.mxu1  ;;  %1975 = vmatmul.mubr.bf16.vlgmr.msra.gmra.mxu1 %v1767_v6 }
 0x2a2   : > { %v1705_v38 = vadd.f32 %v1704_v8, %v1592_v17  ;;  %v1749_v24 = vmax.f32 %v1703_v16, 0.0  ;;  %v1596_v55 = vadd.f32 %v1595_v23, %v3515_v18 }
 0x2a3   : > { %v1597_v27 = vpop.f32.mrf.mxu0  ;;  %v1710_v26 = vpop.f32.mrf.mxu1 }
 0x2a4   : > { %v1750_v41 = vmax.f32 %v1705_v38, 0.0  ;;  %v1598_v33 = vadd.f32 %v1597_v27, %v3512_v35  ;;  %v1769_v37 = vpack.c.bf16 %v1749_v24, %v1747_v31  ;;  %v1709_v47 = vadd.f32 %v1708_v21, %v1596_v55 }
 0x2a5   : > { %v1599_v62 = vpop.f32.mrf.mxu0  ;;  %v1712_v9 = vpop.f32.mrf.mxu1 }
 0x2a6   : > { %v1770_v25 = vpack.c.bf16 %v1750_v41, %v1748_v30  ;;  %v1600_v10 = vadd.f32 %v1599_v62, %v3515_v18  ;;  %v1711_v11 = vadd.f32 %v1710_v26, %v1598_v33  ;;  %v1751_v63 = vmax.f32 %v1709_v47, 0.0 }
 0x2a7   : > { %v1601_v44 = vpop.f32.mrf.mxu0  ;;  %v1714_v34 = vpop.f32.mrf.mxu1 }
 0x2a8   : > { %v1713_v12 = vadd.f32 %v1712_v9, %v1600_v10  ;;  %v1602_v42 = vadd.f32 %v1601_v44, %v3512_v35  ;;  %1982 = vmatprep.mubr.bf16.mxu1 %v1770_v25  ;;  %v1752_v43 = vmax.f32 %v1711_v11, 0.0 }
 0x2a9   : > { %v1605_v36 = vpop.f32.mrf.mxu0  ;;  %v1718_v15 = vpop.f32.mrf.mxu1  ;;  %1983 = vmatmul.mubr.bf16.gmra.mxu1 %v1769_v37 }
 0x2aa   : > { %v1715_v46 = vadd.f32 %v1714_v34, %v1602_v42  ;;  %v1753_v39 = vmax.f32 %v1713_v12, 0.0  ;;  %v1606_v52 = vadd.f32 %v1605_v36, %v3515_v18 }
 0x2ab   : > { %v1607_v50 = vpop.f32.mrf.mxu0  ;;  %v1720_v40 = vpop.f32.mrf.mxu1 }
 0x2ac   : > { %v1754_v51 = vmax.f32 %v1715_v46, 0.0  ;;  %v1608_v19 = vadd.f32 %v1607_v50, %v3512_v35  ;;  %v1771_v48 = vpack.c.bf16 %v1753_v39, %v1751_v63  ;;  %v1719_v59 = vadd.f32 %v1718_v15, %v1606_v52 }
 0x2ad   : > { %v1609_v45 = vpop.f32.mrf.mxu0  ;;  %v1722_v22 = vpop.f32.mrf.mxu1 }
 0x2ae   : > { %v1772_v3 = vpack.c.bf16 %v1754_v51, %v1752_v43  ;;  %v1610_v0 = vadd.f32 %v1609_v45, %v3515_v18  ;;  %v1721_v49 = vadd.f32 %v1720_v40, %v1608_v19  ;;  %v1755_v7 = vmax.f32 %v1719_v59, 0.0 }
 0x2af   : > { %v1611_v54 = vpop.f32.mrf.mxu0  ;;  %v1724_v60 = vpop.f32.mrf.mxu1 }
 0x2b0   : > { %v1723_v53 = vadd.f32 %v1722_v22, %v1610_v0  ;;  %v1612_v57 = vadd.f32 %v1611_v54, %v3512_v35  ;;  %1990 = vmatprep.mubr.bf16.mxu1 %v1772_v3  ;;  %v1756_v58 = vmax.f32 %v1721_v49, 0.0 }
 0x2b1   : > { %1991 = vmatmul.mubr.bf16.gmra.mxu1 %v1771_v48 }
 0x2b2   : > { %v1725_v56 = vadd.f32 %v1724_v60, %v1612_v57  ;;  %v1757_v61 = vmax.f32 %v1723_v53, 0.0 }
 0x2b4   : > { %v1758_v28 = vmax.f32 %v1725_v56, 0.0  ;;  %v1773_v1 = vpack.c.bf16 %v1757_v61, %v1755_v7 }
 0x2b6   : > { %v1774_v4 = vpack.c.bf16 %v1758_v28, %v1756_v58 }
 0x2b8   : > { %1998 = vmatprep.mubr.bf16.mxu1 %v1774_v4 }
 0x2b9   : > { %1999 = vmatmul.mubr.bf16.gmra.mxu1 %v1773_v1 }
 0x341   : > { %v2263_v18 = vpop.f32.mrf.mxu0 }
 0x343   : > { %v2264_v35 = vpop.f32.mrf.mxu0 }
 0x344   : > { %v2265_v29 = vadd.f32 %v2264_v35, %v2263_v18 }
 0x345   : > { %v2266_v13 = vpop.f32.mrf.mxu0 }
 0x346   : > { %v1945_v2 = vadd.f32 %v2265_v29, %v3552_v5 }
 0x347   : > { %v2267_v6 = vpop.f32.mrf.mxu0 }
 0x348   : > { %2508 = vtanh.f32 %v1945_v2  ;;  %v2268_v32 = vadd.f32 %v2267_v6, %v2266_v13 }
 0x349   : > { %v2269_v8 = vpop.f32.mrf.mxu0 }
 0x34a   : > { %v1948_v14 = vadd.f32 %v2268_v32, %v3552_v5 }
 0x34b   : > { %v2270_v16 = vpop.f32.mrf.mxu0 }
 0x34c   : > { %2510 = vtanh.f32 %v1948_v14  ;;  %v2271_v17 = vadd.f32 %v2270_v16, %v2269_v8 }
 0x34d   : > { %v2272_v20 = vpop.f32.mrf.mxu0 }
 0x34e   : > { %v1953_v23 = vadd.f32 %v2271_v17, %v3552_v5 }
 0x34f   : > { %v2273_v21 = vpop.f32.mrf.mxu0 }
 0x350   : > { %2512 = vtanh.f32 %v1953_v23  ;;  %v2274_v38 = vadd.f32 %v2273_v21, %v2272_v20 }
 0x351   : > { %v2275_v24 = vpop.f32.mrf.mxu0 }
 0x352   : > { %v1956_v27 = vadd.f32 %v2274_v38, %v3552_v5 }
 0x353   : > { %v2276_v26 = vpop.f32.mrf.mxu0 }
 0x354   : > { %2514 = vtanh.f32 %v1956_v27  ;;  %v2277_v30 = vadd.f32 %v2276_v26, %v2275_v24 }
 0x355   : > { %v2509_v41 = vpop.eup %2508  ;;  %v2278_v33 = vpop.f32.mrf.mxu0 }
 0x356   : > { %2023 = vst [vmem:[%s3561_s29] sm:$0xff] %v2509_v41  ;;  %v1961_v31 = vadd.f32 %v2277_v30, %v3552_v5 }
 0x357   : > { %v2279_v55 = vpop.f32.mrf.mxu0 }
 0x358   : > { %2516 = vtanh.f32 %v1961_v31  ;;  %v2280_v62 = vadd.f32 %v2279_v55, %v2278_v33 }
 0x359   : > { %v2511_v9 = vpop.eup %2510  ;;  %v2281_v25 = vpop.f32.mrf.mxu0 }
 0x35a   : > { %2024 = vst [vmem:[%s3561_s29 + $0x8] sm:$0xff] %v2511_v9  ;;  %v1964_v10 = vadd.f32 %v2280_v62, %v3552_v5 }
 0x35b   : > { %v2282_v37 = vpop.f32.mrf.mxu0 }
 0x35c   : > { %2518 = vtanh.f32 %v1964_v10  ;;  %v2283_v44 = vadd.f32 %v2282_v37, %v2281_v25 }
 0x35d   : > { %v2513_v34 = vpop.eup %2512  ;;  %v2284_v11 = vpop.f32.mrf.mxu0 }
 0x35e   : > { %2025 = vst [vmem:[%s3561_s29 + $0x10] sm:$0xff] %v2513_v34  ;;  %v1969_v12 = vadd.f32 %v2283_v44, %v3552_v5 }
 0x35f   : > { %v2285_v42 = vpop.f32.mrf.mxu0 }
 0x360   : > { %2520 = vtanh.f32 %v1969_v12  ;;  %v2286_v47 = vadd.f32 %v2285_v42, %v2284_v11 }
 0x361   : > { %v2515_v36 = vpop.eup %2514  ;;  %v2287_v15 = vpop.f32.mrf.mxu1 }
 0x362   : > { %2026 = vst [vmem:[%s3561_s29 + $0x18] sm:$0xff] %v2515_v36  ;;  %v1972_v46 = vadd.f32 %v2286_v47, %v3552_v5 }
 0x363   : > { %v2288_v39 = vpop.f32.mrf.mxu1 }
 0x364   : > { %2522 = vtanh.f32 %v1972_v46  ;;  %v2289_v50 = vadd.f32 %v2288_v39, %v2287_v15 }
 0x365   : > { %v2517_v40 = vpop.eup %2516  ;;  %v2290_v43 = vpop.f32.mrf.mxu1 }
 0x366   : > { %2027 = vst [vmem:[%s3561_s29 + $0x20] sm:$0xff] %v2517_v40  ;;  %v1977_v51 = vadd.f32 %v2289_v50, %v3552_v5 }
 0x367   : > { %v2291_v19 = vpop.f32.mrf.mxu1 }
 0x368   : > { %2524 = vtanh.f32 %v1977_v51  ;;  %v2292_v63 = vadd.f32 %v2291_v19, %v2290_v43 }
 0x369   : > { %v2519_v52 = vpop.eup %2518  ;;  %v2293_v45 = vpop.f32.mrf.mxu1 }
 0x36a   : > { %2028 = vst [vmem:[%s3561_s29 + $0x28] sm:$0xff] %v2519_v52  ;;  %v1980_v22 = vadd.f32 %v2292_v63, %v3552_v5 }
 0x36b   : > { %v2294_v3 = vpop.f32.mrf.mxu1 }
 0x36c   : > { %2526 = vtanh.f32 %v1980_v22  ;;  %v2295_v0 = vadd.f32 %v2294_v3, %v2293_v45 }
 0x36d   : > { %v2521_v48 = vpop.eup %2520  ;;  %v2296_v54 = vpop.f32.mrf.mxu1 }
 0x36e   : > { %2029 = vst [vmem:[%s3561_s29 + $0x30] sm:$0xff] %v2521_v48  ;;  %v1985_v49 = vadd.f32 %v2295_v0, %v3552_v5 }
 0x36f   : > { %v2297_v53 = vpop.f32.mrf.mxu1 }
 0x370   : > { %2528 = vtanh.f32 %v1985_v49  ;;  %v2298_v57 = vadd.f32 %v2297_v53, %v2296_v54 }
 0x371   : > { %v2523_v59 = vpop.eup %2522  ;;  %v2299_v60 = vpop.f32.mrf.mxu1 }
 0x372   : > { %2030 = vst [vmem:[%s3561_s29 + $0x38] sm:$0xff] %v2523_v59  ;;  %v1988_v56 = vadd.f32 %v2298_v57, %v3552_v5 }
 0x373   : > { %v2300_v61 = vpop.f32.mrf.mxu1 }
 0x374   : > { %2530 = vtanh.f32 %v1988_v56  ;;  %v2301_v58 = vadd.f32 %v2300_v61, %v2299_v60 }
 0x375   : > { %v2525_v28 = vpop.eup %2524  ;;  %v2302_v7 = vpop.f32.mrf.mxu1 }
 0x376   : > { %2031 = vst [vmem:[%s3561_s29 + $0x40] sm:$0xff] %v2525_v28  ;;  %v1993_v4 = vadd.f32 %v2301_v58, %v3552_v5 }
 0x377   : > { %v2303_v1 = vpop.f32.mrf.mxu1 }
 0x378   : > { %2532 = vtanh.f32 %v1993_v4  ;;  %v2304_v18 = vadd.f32 %v2303_v1, %v2302_v7 }
 0x379   : > { %v2527_v35 = vpop.eup %2526  ;;  %v2305_v29 = vpop.f32.mrf.mxu1 }
 0x37a   : > { %2032 = vst [vmem:[%s3561_s29 + $0x48] sm:$0xff] %v2527_v35  ;;  %v1996_v13 = vadd.f32 %v2304_v18, %v3552_v5 }
 0x37b   : > { %v2306_v2 = vpop.f32.mrf.mxu1 }
 0x37c   : > { %2534 = vtanh.f32 %v1996_v13  ;;  %v2307_v6 = vadd.f32 %v2306_v2, %v2305_v29 }
 0x37d   : > { %v2529_v32 = vpop.eup %2528  ;;  %v2308_v8 = vpop.f32.mrf.mxu1 }
 0x37e   : > { %2033 = vst [vmem:[%s3561_s29 + $0x50] sm:$0xff] %v2529_v32  ;;  %v2001_v14 = vadd.f32 %v2307_v6, %v3552_v5 }
 0x37f   : > { %v2309_v16 = vpop.f32.mrf.mxu1 }
 0x380   : > { %2536 = vtanh.f32 %v2001_v14  ;;  %v2310_v17 = vadd.f32 %v2309_v16, %v2308_v8 }
 0x381   : > { %v2531_v20 = vpop.eup %2530 }
 0x382   : > { %2034 = vst [vmem:[%s3561_s29 + $0x58] sm:$0xff] %v2531_v20  ;;  %v2004_v23 = vadd.f32 %v2310_v17, %v3552_v5 }
 0x384   : > { %2538 = vtanh.f32 %v2004_v23 }
 0x385   : > { %v2533_v21 = vpop.eup %2532 }
 0x386   : > { %2035 = vst [vmem:[%s3561_s29 + $0x60] sm:$0xff] %v2533_v21 }
 0x389   : > { %v2535_v38 = vpop.eup %2534 }
 0x38a   : > { %2036 = vst [vmem:[%s3561_s29 + $0x68] sm:$0xff] %v2535_v38 }
 0x38d   : > { %v2537_v24 = vpop.eup %2536 }
 0x38e   : > { %2037 = vst [vmem:[%s3561_s29 + $0x70] sm:$0xff] %v2537_v24 }
 0x391   : > { %v2539_v5 = vpop.eup %2538 }
 0x392   : > { %2038 = vst [vmem:[%s3561_s29 + $0x78] sm:$0xff] %v2539_v5 }
 0x393   : > { %2579 = shalt.err (!%p2576_p0)
}
 0x394   : > { %s2580_s30 = scalar_lea.hbm %s3595_s21, 2048  ;;  %s2584_s18 = scalar_lea.hbm %s3652_s10, 4096 }
 0x395   : > { %p2581_p1 = scmp.ne.s32.totalorder %s3595_s21, %s2580_s30  ;;  %p2585_p4 = scmp.lt.s32.totalorder %s3595_s21, %s3652_s10 }
 0x396   : > { %p2586_p7 = scmp.lt.s32.totalorder %s2584_s18, %s2580_s30 }
 0x397   : > { %p2582_p2 = pnand %p2581_p1, %p2732_p5 }
 0x398   : > { %p2587_p6 = por %p2586_p7, %p2585_p4 }
 0x399   : > { %p2583_p3 = pneg %p2582_p2 }
 0x39b   : > { %p2588_p8 = pnand %p2587_p6, %p2583_p3 }
 0x39d   : > { %2591 = shalt.err (!%p2588_p8)
}
 0x39e   : > { %s2637_s26 = smov 128   ;;  %s2638_s27 = smov 8  }
 0x39f   : > { %2331 = dma.vmem_to_hbm [thread:$0]  (%p2732_p5), %s3597_s12, 2048, %s3595_s21, %s3602_s25, %s2637_s26, %s2637_s26, %s2638_s27  }
 0x3a0 PF: > { %p2343_p9 = scmp.ge.s32.totalorder %s2630_s16, 2  ;;  %s2068_s28 = sand.u32 1, %s2618_s13  }
 0x3a1   : > { %p3656_p10 = scmp.ne.s32.totalorder %s3654_s24, 0  ;;  %s2069_s30 = scalar_lea.sflag [#allocation4], %s2068_s28 }
 0x3a3   : > { %p2338_p11 = pnand %p2343_p9, %p3656_p10 }
 0x3a5   : > { %p2339_p12 = pneg %p2338_p11 }
 0x3a7   : > { %2613 = dma.done.wait (%p2339_p12), %s2069_s30, 2048  }
 0x3a8   : > { %2615 = vsyncadd (%p2339_p12), %s2069_s30, 4294965248  ;;  %p21_p13 = scmp.ge.s32.totalorder %s2719_s19, 4   ;;  %s3657_s13 = smov %s2622_s14 }
 0x3a9   : > { %s3658_s14 = smov %s2626_s15  ;;  %s3659_s15 = smov %s2730_s22 }
 0x3aa   : > { %s3660_s16 = smov %s2719_s19  ;;  %23 = sbr.rel (!%p21_p13) target bundleno = 4 (0x4), region = 100 }
 0x3af   :  { %2074 = vsyncpa [#allocation3], 1 }
 0x3b0   :  { %2076 = vsyncpa [#allocation3 + $0x1], 1 }
 0x3b1   :  { %2077 = vsyncpa [#allocation4], 1 }
 0x3b2   :  { %2079 = vsyncpa [#allocation4 + $0x1], 1 }

</bundles_post_ra>
